<compile_context>
chip_gen: v5e
topology: v5e:2x2
jax: 0.10.0
libtpu: 0.0.40
codegen_flags: <defaults>
</compile_context>

<pallas_src>
import functools

import jax
import jax.numpy as jnp
from jax import lax
from jax.experimental import pallas as pl
from jax.experimental.pallas import tpu as pltpu

# Full-precision f32 matmuls everywhere (kernel trace + reference) so the
# numerical comparison below is apples-to-apples.
jax.config.update("jax_default_matmul_precision", "highest")


def mhsa_kernel(x_ref, wqkv_ref, wp_ref, bp_ref, o_ref, qkv_ref, cat_ref,
                *, num_heads, head_size):
    """One grid step = (batch element, query tile).

    x_ref    : (1, T, C)   input block (stays resident across the q-tile axis)
    wqkv_ref : (C, 3C)     fused [Q | K | V] weights (Q columns pre-scaled)
    wp_ref   : (C, C)      output projection W^T
    bp_ref   : (1, C)      output projection bias
    o_ref    : (1, TQ, C)  output block for this query tile
    qkv_ref  : (T, 3C)     VMEM scratch: fused projection for the current batch
    cat_ref  : (TQ, C)     VMEM scratch: concatenated head outputs
    """
    qt = pl.program_id(1)
    T = x_ref.shape[1]
    C = x_ref.shape[2]
    TQ = o_ref.shape[1]

    # Fused Q/K/V projection: one lane-dense (T,C)x(C,3C) matmul, computed once
    # per batch element and reused across all query tiles (scratch persists
    # across the "arbitrary" q-tile grid axis).
    @pl.when(qt == 0)
    def _():
        qkv = jnp.dot(x_ref[0], wqkv_ref[...],
                      preferred_element_type=jnp.float32)
        qkv_ref[...] = qkv.astype(qkv_ref.dtype)

    q0 = pl.multiple_of(qt * TQ, TQ)

    # Causal mask for this query tile, derived from the tile offset.
    row = q0 + lax.broadcasted_iota(jnp.int32, (TQ, T), 0)
    col = lax.broadcasted_iota(jnp.int32, (TQ, T), 1)
    causal = row >= col
    neg_big = jnp.float32(-1e30)  # finite "-inf" (NaN-safe if masks ever change)

    # Q rows for this tile, all heads at once (already scaled by C**-0.5).
    q_all = qkv_ref[pl.ds(q0, TQ), 0:C]                         # (TQ, C)

    for h in range(num_heads):                                  # static unroll
        hs0 = h * head_size
        q = q_all[:, hs0:hs0 + head_size]                       # (TQ, hs)
        k = qkv_ref[:, C + hs0:C + hs0 + head_size]             # (T, hs)
        v = qkv_ref[:, 2 * C + hs0:2 * C + hs0 + head_size]     # (T, hs)

        # scores = q @ k^T without materializing k.T
        s = lax.dot_general(q, k, (((1,), (1,)), ((), ())),
                            preferred_element_type=jnp.float32)  # (TQ, T)
        s = jnp.where(causal, s, neg_big)

        # softmax statistics in f32
        m = jnp.max(s, axis=-1, keepdims=True)
        p = jnp.exp(s - m)
        denom = jnp.sum(p, axis=-1, keepdims=True)

        o_h = jnp.dot(p.astype(v.dtype), v,
                      preferred_element_type=jnp.float32)        # (TQ, hs)
        # normalize the small (TQ, hs) output instead of the (TQ, T) probs
        o_h = o_h * pl.reciprocal(denom, approx=False)
        # TODO(synk): attention dropout skipped (eval-mode identity).

        cat_ref[:, hs0:hs0 + head_size] = o_h.astype(cat_ref.dtype)

    # Output projection over fused head outputs: one dense (TQ,C)x(C,C) matmul.
    y = jnp.dot(cat_ref[...], wp_ref[...], preferred_element_type=jnp.float32)
    y = y + bp_ref[...].astype(jnp.float32)
    # TODO(synk): output dropout skipped (eval-mode identity).
    o_ref[0] = y.astype(o_ref.dtype)


def fuse_qkv_weights(wq, wk, wv, n_embedding):
    """Stack per-head (H, C, hs) weights into one (C, 3C) fused matrix.

    Column layout: [ Q_h0 | ... | Q_hH-1 | K_h0 | ... | V_h0 | ... ].
    The softmax scale (n_embedding ** -0.5, matching the PyTorch module which
    uses the embedding dim, not head_size) is folded into the Q columns so it
    costs nothing at runtime.
    """
    H, C, hs = wq.shape
    scale = jnp.asarray(float(n_embedding) ** -0.5, wq.dtype)
    wq_f = jnp.transpose(wq, (1, 0, 2)).reshape(C, H * hs) * scale
    wk_f = jnp.transpose(wk, (1, 0, 2)).reshape(C, H * hs)
    wv_f = jnp.transpose(wv, (1, 0, 2)).reshape(C, H * hs)
    return jnp.concatenate([wq_f, wk_f, wv_f], axis=1)           # (C, 3C)


def multi_head_self_attention(x, w_qkv, wp_t, bp, *, num_heads, head_size,
                              q_tile=None):
    """x: (B, T, C); w_qkv: (C, 3C) fused; wp_t: (C, C) = W_proj^T; bp: (1, C)."""
    B, T, C = x.shape
    assert w_qkv.shape == (C, 3 * C)
    assert num_heads * head_size == C
    if q_tile is None:
        q_tile = T if T <= 128 else 128
    assert T % q_tile == 0 and q_tile % 8 == 0, "q_tile must divide T, mult of 8"
    n_q = T // q_tile

    kernel = functools.partial(mhsa_kernel, num_heads=num_heads,
                               head_size=head_size)
    return pl.pallas_call(
        kernel,
        out_shape=jax.ShapeDtypeStruct((B, T, C), x.dtype),
        grid=(B, n_q),
        in_specs=[
            pl.BlockSpec((1, T, C), lambda b, q: (b, 0, 0)),     # x (resident per b)
            pl.BlockSpec((C, 3 * C), lambda b, q: (0, 0)),       # fused QKV weight
            pl.BlockSpec((C, C), lambda b, q: (0, 0)),           # W_proj^T
            pl.BlockSpec((1, C), lambda b, q: (0, 0)),           # bias
        ],
        out_specs=pl.BlockSpec((1, q_tile, C), lambda b, q: (b, q, 0)),
        scratch_shapes=[
            pltpu.VMEM((T, 3 * C), x.dtype),    # fused QKV, persists across q tiles
            pltpu.VMEM((q_tile, C), x.dtype),   # concatenated head outputs
        ],
        # Batch axis parallel (megacore / 2 TCs on v7x); q-tile axis carries the
        # per-batch QKV scratch so it must stay "arbitrary".
        # TODO(synk): for long T on v7x (64 MiB VMEM) shrink q_tile and tile K/V.
        compiler_params=pltpu.CompilerParams(
            dimension_semantics=("parallel", "arbitrary")),
    )(x, w_qkv, wp_t, bp)


def reference_mhsa(x, wq, wk, wv, wp_t, bp):
    """Plain-JAX reference matching the PyTorch forward (eval mode)."""
    B, T, C = x.shape
    H = wq.shape[0]
    scale = float(C) ** (-0.5)
    mask = jnp.tril(jnp.ones((T, T), dtype=bool))
    outs = []
    for h in range(H):
        k = x @ wk[h]
        q = x @ wq[h]
        v = x @ wv[h]
        wei = (q @ jnp.swapaxes(k, -2, -1)) * scale
        wei = jnp.where(mask, wei, -jnp.inf)
        wei = jax.nn.softmax(wei, axis=-1)
        outs.append(wei @ v)
    cat = jnp.concatenate(outs, axis=-1)
    return cat @ wp_t + bp[0]


if __name__ == "__main__":
    # Small shapes consistent with the module:
    #   num_heads=4, head_size=8, n_embedding=32, context_length=16, batch=2.
    B, T = 2, 16
    num_heads, head_size = 4, 8
    n_embedding = num_heads * head_size          # 32

    key = jax.random.PRNGKey(0)
    kx, kk, kq, kv, kp, kb = jax.random.split(key, 6)

    x = jax.random.normal(kx, (B, T, n_embedding), dtype=jnp.float32)
    # nn.Linear(n_embedding, head_size, bias=False).weight is (hs, C); we store
    # the transpose per head: (H, C, hs).
    wq = jax.random.normal(kq, (num_heads, n_embedding, head_size), jnp.float32) * 0.1
    wk = jax.random.normal(kk, (num_heads, n_embedding, head_size), jnp.float32) * 0.1
    wv = jax.random.normal(kv, (num_heads, n_embedding, head_size), jnp.float32) * 0.1
    # projection nn.Linear(C, C): store W^T as (C, C) plus bias as (1, C).
    wp_t = jax.random.normal(kp, (n_embedding, n_embedding), jnp.float32) * 0.1
    bp = jax.random.normal(kb, (1, n_embedding), jnp.float32) * 0.1

    w_qkv = fuse_qkv_weights(wq, wk, wv, n_embedding)

    out = multi_head_self_attention(
        x, w_qkv, wp_t, bp, num_heads=num_heads, head_size=head_size,
        q_tile=8)                                # 2 query tiles per batch element
    out = jax.block_until_ready(out)

    ref = reference_mhsa(x, wq, wk, wv, wp_t, bp)
    assert out.shape == (B, T, n_embedding)
    err = float(jnp.max(jnp.abs(out - ref)))
    assert err < 1e-3, f"mismatch vs reference (max abs err {err})"

    print("KERNEL_OK")
</pallas_src>

<mosaic_0001>
module attributes {stable_mosaic.version = 11 : i64} {
  func.func @mhsa_kernel(%arg0: i32, %arg1: i32, %arg2: memref<1x16x32xf32, #tpu.memory_space<vmem>>, %arg3: memref<32x96xf32, #tpu.memory_space<vmem>>, %arg4: memref<32x32xf32, #tpu.memory_space<vmem>>, %arg5: memref<1x32xf32, #tpu.memory_space<vmem>>, %arg6: memref<1x8x32xf32, #tpu.memory_space<vmem>>, %arg7: memref<16x96xf32, #tpu.memory_space<vmem>>, %arg8: memref<8x32xf32, #tpu.memory_space<vmem>>) attributes {dimension_semantics = [#tpu.dimension_semantics<parallel>, #tpu.dimension_semantics<arbitrary>], iteration_bounds = array<i64: 2, 2>, scalar_prefetch = 0 : i64, scratch_operands = 2 : i64, tpu.core_type = #tpu.core_type<tc>, window_params = [{transform_indices = @transform_0, window_bounds = array<i64: 1, 16, 32>}, {pipeline_mode = #tpu.pipeline_mode<synchronous>, transform_indices = @transform_1, window_bounds = array<i64: 32, 96>}, {pipeline_mode = #tpu.pipeline_mode<synchronous>, transform_indices = @transform_2, window_bounds = array<i64: 32, 32>}, {pipeline_mode = #tpu.pipeline_mode<synchronous>, transform_indices = @transform_3, window_bounds = array<i64: 1, 32>}, {transform_indices = @transform_4, window_bounds = array<i64: 1, 8, 32>}]} {
    %c0_i32 = arith.constant 0 : i32
    %0 = arith.cmpi eq, %arg1, %c0_i32 : i32
    %1 = arith.extui %0 : i1 to i32
    %c0_i32_0 = arith.constant 0 : i32
    %2 = arith.cmpi ne, %1, %c0_i32_0 : i32
    scf.if %2 {
      %c0_43 = arith.constant 0 : index
      %c0_44 = arith.constant 0 : index
      %c0_45 = arith.constant 0 : index
      %93 = vector.load %arg2[%c0_43, %c0_44, %c0_45] : memref<1x16x32xf32, #tpu.memory_space<vmem>>, vector<1x16x32xf32>
      %94 = vector.shape_cast %93 : vector<1x16x32xf32> to vector<16x32xf32>
      %c0_46 = arith.constant 0 : index
      %c0_47 = arith.constant 0 : index
      %95 = vector.load %arg3[%c0_46, %c0_47] : memref<32x96xf32, #tpu.memory_space<vmem>>, vector<32x96xf32>
      %cst_48 = arith.constant dense<0.000000e+00> : vector<16x96xf32>
      %96 = tpu.matmul %94, %95, %cst_48 {dimension_numbers = #tpu.dot_dimension_numbers<[1], [0], [0], [1], [0, 0, 1, 1], [], []>, precision = #tpu.contract_precision<fp32>} : vector<16x32xf32>, vector<32x96xf32>, vector<16x96xf32> -> vector<16x96xf32>
      %c0_49 = arith.constant 0 : index
      %c0_50 = arith.constant 0 : index
      %97 = vector.load %arg7[%c0_49, %c0_50] : memref<16x96xf32, #tpu.memory_space<vmem>>, vector<16x96xf32>
      tpu.vector_store %arg7[%c0_49, %c0_50], %96 {strides = array<i32>} : memref<16x96xf32, #tpu.memory_space<vmem>>, vector<16x96xf32>,
    } else {
    }
    %c8_i32 = arith.constant 8 : i32
    %3 = arith.muli %arg1, %c8_i32 : i32
    %4 = tpu.assume_multiple %3, 8 : i32
    %5 = tpu.iota {dimensions = array<i32: 0>} : vector<8x16xi32>
    %6 = vector.broadcast %4 : i32 to vector<8x16xi32>
    %7 = arith.addi %6, %5 : vector<8x16xi32>
    %8 = tpu.iota {dimensions = array<i32: 1>} : vector<8x16xi32>
    %9 = arith.cmpi sge, %7, %8 : vector<8x16xi32>
    %10 = arith.index_cast %4 : i32 to index
    %c0 = arith.constant 0 : index
    %11 = vector.load %arg7[%10, %c0] : memref<16x96xf32, #tpu.memory_space<vmem>>, vector<8x32xf32>
    %12 = vector.extract_strided_slice %11 {offsets = [0, 0], sizes = [8, 8], strides = [1, 1]} : vector<8x32xf32> to vector<8x8xf32>
    %c0_1 = arith.constant 0 : index
    %c32 = arith.constant 32 : index
    %13 = vector.load %arg7[%c0_1, %c32] : memref<16x96xf32, #tpu.memory_space<vmem>>, vector<16x8xf32>
    %c0_2 = arith.constant 0 : index
    %c64 = arith.constant 64 : index
    %14 = vector.load %arg7[%c0_2, %c64] : memref<16x96xf32, #tpu.memory_space<vmem>>, vector<16x8xf32>
    %cst = arith.constant dense<0.000000e+00> : vector<8x16xf32>
    %15 = tpu.matmul %12, %13, %cst {dimension_numbers = #tpu.dot_dimension_numbers<[1], [1], [0], [0], [0, 0, 1, 0], [], []>, precision = #tpu.contract_precision<fp32>} : vector<8x8xf32>, vector<16x8xf32>, vector<8x16xf32> -> vector<8x16xf32>
    %cst_3 = arith.constant -1.000000e+30 : f32
    %16 = vector.broadcast %cst_3 : f32 to vector<8x16xf32>
    %17 = arith.select %9, %15, %16 : vector<8x16xi1>, vector<8x16xf32>
    %cst_4 = arith.constant dense<0xFF800000> : vector<8xf32>
    %18 = vector.multi_reduction <maximumf>, %17, %cst_4 [1] : vector<8x16xf32> to vector<8xf32>
    %19 = vector.shape_cast %18 : vector<8xf32> to vector<8x1xf32>
    %20 = vector.broadcast %19 : vector<8x1xf32> to vector<8x16xf32>
    %21 = arith.subf %17, %20 : vector<8x16xf32>
    %22 = math.exp %21 : vector<8x16xf32>
    %cst_5 = arith.constant dense<0.000000e+00> : vector<8xf32>
    %23 = vector.multi_reduction <add>, %22, %cst_5 [1] : vector<8x16xf32> to vector<8xf32>
    %24 = vector.shape_cast %23 : vector<8xf32> to vector<8x1xf32>
    %cst_6 = arith.constant dense<0.000000e+00> : vector<8x8xf32>
    %25 = tpu.matmul %22, %14, %cst_6 {dimension_numbers = #tpu.dot_dimension_numbers<[1], [0], [0], [1], [0, 0, 1, 1], [], []>, precision = #tpu.contract_precision<fp32>} : vector<8x16xf32>, vector<16x8xf32>, vector<8x8xf32> -> vector<8x8xf32>
    %26 = tpu.reciprocal %24 : vector<8x1xf32> -> vector<8x1xf32>
    %27 = vector.broadcast %26 : vector<8x1xf32> to vector<8x8xf32>
    %28 = arith.mulf %25, %27 : vector<8x8xf32>
    %c0_7 = arith.constant 0 : index
    %c0_8 = arith.constant 0 : index
    %29 = vector.load %arg8[%c0_7, %c0_8] : memref<8x32xf32, #tpu.memory_space<vmem>>, vector<8x8xf32>
    tpu.vector_store %arg8[%c0_7, %c0_8], %28 {strides = array<i32>} : memref<8x32xf32, #tpu.memory_space<vmem>>, vector<8x8xf32>,
    %30 = vector.extract_strided_slice %11 {offsets = [0, 8], sizes = [8, 8], strides = [1, 1]} : vector<8x32xf32> to vector<8x8xf32>
    %c0_9 = arith.constant 0 : index
    %c40 = arith.constant 40 : index
    %31 = vector.load %arg7[%c0_9, %c40] : memref<16x96xf32, #tpu.memory_space<vmem>>, vector<16x8xf32>
    %c0_10 = arith.constant 0 : index
    %c72 = arith.constant 72 : index
    %32 = vector.load %arg7[%c0_10, %c72] : memref<16x96xf32, #tpu.memory_space<vmem>>, vector<16x8xf32>
    %cst_11 = arith.constant dense<0.000000e+00> : vector<8x16xf32>
    %33 = tpu.matmul %30, %31, %cst_11 {dimension_numbers = #tpu.dot_dimension_numbers<[1], [1], [0], [0], [0, 0, 1, 0], [], []>, precision = #tpu.contract_precision<fp32>} : vector<8x8xf32>, vector<16x8xf32>, vector<8x16xf32> -> vector<8x16xf32>
    %cst_12 = arith.constant -1.000000e+30 : f32
    %34 = vector.broadcast %cst_12 : f32 to vector<8x16xf32>
    %35 = arith.select %9, %33, %34 : vector<8x16xi1>, vector<8x16xf32>
    %cst_13 = arith.constant dense<0xFF800000> : vector<8xf32>
    %36 = vector.multi_reduction <maximumf>, %35, %cst_13 [1] : vector<8x16xf32> to vector<8xf32>
    %37 = vector.shape_cast %36 : vector<8xf32> to vector<8x1xf32>
    %38 = vector.broadcast %37 : vector<8x1xf32> to vector<8x16xf32>
    %39 = arith.subf %35, %38 : vector<8x16xf32>
    %40 = math.exp %39 : vector<8x16xf32>
    %cst_14 = arith.constant dense<0.000000e+00> : vector<8xf32>
    %41 = vector.multi_reduction <add>, %40, %cst_14 [1] : vector<8x16xf32> to vector<8xf32>
    %42 = vector.shape_cast %41 : vector<8xf32> to vector<8x1xf32>
    %cst_15 = arith.constant dense<0.000000e+00> : vector<8x8xf32>
    %43 = tpu.matmul %40, %32, %cst_15 {dimension_numbers = #tpu.dot_dimension_numbers<[1], [0], [0], [1], [0, 0, 1, 1], [], []>, precision = #tpu.contract_precision<fp32>} : vector<8x16xf32>, vector<16x8xf32>, vector<8x8xf32> -> vector<8x8xf32>
    %44 = tpu.reciprocal %42 : vector<8x1xf32> -> vector<8x1xf32>
    %45 = vector.broadcast %44 : vector<8x1xf32> to vector<8x8xf32>
    %46 = arith.mulf %43, %45 : vector<8x8xf32>
    %c0_16 = arith.constant 0 : index
    %c8 = arith.constant 8 : index
    %47 = vector.load %arg8[%c0_16, %c8] : memref<8x32xf32, #tpu.memory_space<vmem>>, vector<8x8xf32>
    tpu.vector_store %arg8[%c0_16, %c8], %46 {strides = array<i32>} : memref<8x32xf32, #tpu.memory_space<vmem>>, vector<8x8xf32>,
    %48 = vector.extract_strided_slice %11 {offsets = [0, 16], sizes = [8, 8], strides = [1, 1]} : vector<8x32xf32> to vector<8x8xf32>
    %c0_17 = arith.constant 0 : index
    %c48 = arith.constant 48 : index
    %49 = vector.load %arg7[%c0_17, %c48] : memref<16x96xf32, #tpu.memory_space<vmem>>, vector<16x8xf32>
    %c0_18 = arith.constant 0 : index
    %c80 = arith.constant 80 : index
    %50 = vector.load %arg7[%c0_18, %c80] : memref<16x96xf32, #tpu.memory_space<vmem>>, vector<16x8xf32>
    %cst_19 = arith.constant dense<0.000000e+00> : vector<8x16xf32>
    %51 = tpu.matmul %48, %49, %cst_19 {dimension_numbers = #tpu.dot_dimension_numbers<[1], [1], [0], [0], [0, 0, 1, 0], [], []>, precision = #tpu.contract_precision<fp32>} : vector<8x8xf32>, vector<16x8xf32>, vector<8x16xf32> -> vector<8x16xf32>
    %cst_20 = arith.constant -1.000000e+30 : f32
    %52 = vector.broadcast %cst_20 : f32 to vector<8x16xf32>
    %53 = arith.select %9, %51, %52 : vector<8x16xi1>, vector<8x16xf32>
    %cst_21 = arith.constant dense<0xFF800000> : vector<8xf32>
    %54 = vector.multi_reduction <maximumf>, %53, %cst_21 [1] : vector<8x16xf32> to vector<8xf32>
    %55 = vector.shape_cast %54 : vector<8xf32> to vector<8x1xf32>
    %56 = vector.broadcast %55 : vector<8x1xf32> to vector<8x16xf32>
    %57 = arith.subf %53, %56 : vector<8x16xf32>
    %58 = math.exp %57 : vector<8x16xf32>
    %cst_22 = arith.constant dense<0.000000e+00> : vector<8xf32>
    %59 = vector.multi_reduction <add>, %58, %cst_22 [1] : vector<8x16xf32> to vector<8xf32>
    %60 = vector.shape_cast %59 : vector<8xf32> to vector<8x1xf32>
    %cst_23 = arith.constant dense<0.000000e+00> : vector<8x8xf32>
    %61 = tpu.matmul %58, %50, %cst_23 {dimension_numbers = #tpu.dot_dimension_numbers<[1], [0], [0], [1], [0, 0, 1, 1], [], []>, precision = #tpu.contract_precision<fp32>} : vector<8x16xf32>, vector<16x8xf32>, vector<8x8xf32> -> vector<8x8xf32>
    %62 = tpu.reciprocal %60 : vector<8x1xf32> -> vector<8x1xf32>
    %63 = vector.broadcast %62 : vector<8x1xf32> to vector<8x8xf32>
    %64 = arith.mulf %61, %63 : vector<8x8xf32>
    %c0_24 = arith.constant 0 : index
    %c16 = arith.constant 16 : index
    %65 = vector.load %arg8[%c0_24, %c16] : memref<8x32xf32, #tpu.memory_space<vmem>>, vector<8x8xf32>
    tpu.vector_store %arg8[%c0_24, %c16], %64 {strides = array<i32>} : memref<8x32xf32, #tpu.memory_space<vmem>>, vector<8x8xf32>,
    %66 = vector.extract_strided_slice %11 {offsets = [0, 24], sizes = [8, 8], strides = [1, 1]} : vector<8x32xf32> to vector<8x8xf32>
    %c0_25 = arith.constant 0 : index
    %c56 = arith.constant 56 : index
    %67 = vector.load %arg7[%c0_25, %c56] : memref<16x96xf32, #tpu.memory_space<vmem>>, vector<16x8xf32>
    %c0_26 = arith.constant 0 : index
    %c88 = arith.constant 88 : index
    %68 = vector.load %arg7[%c0_26, %c88] : memref<16x96xf32, #tpu.memory_space<vmem>>, vector<16x8xf32>
    %cst_27 = arith.constant dense<0.000000e+00> : vector<8x16xf32>
    %69 = tpu.matmul %66, %67, %cst_27 {dimension_numbers = #tpu.dot_dimension_numbers<[1], [1], [0], [0], [0, 0, 1, 0], [], []>, precision = #tpu.contract_precision<fp32>} : vector<8x8xf32>, vector<16x8xf32>, vector<8x16xf32> -> vector<8x16xf32>
    %cst_28 = arith.constant -1.000000e+30 : f32
    %70 = vector.broadcast %cst_28 : f32 to vector<8x16xf32>
    %71 = arith.select %9, %69, %70 : vector<8x16xi1>, vector<8x16xf32>
    %cst_29 = arith.constant dense<0xFF800000> : vector<8xf32>
    %72 = vector.multi_reduction <maximumf>, %71, %cst_29 [1] : vector<8x16xf32> to vector<8xf32>
    %73 = vector.shape_cast %72 : vector<8xf32> to vector<8x1xf32>
    %74 = vector.broadcast %73 : vector<8x1xf32> to vector<8x16xf32>
    %75 = arith.subf %71, %74 : vector<8x16xf32>
    %76 = math.exp %75 : vector<8x16xf32>
    %cst_30 = arith.constant dense<0.000000e+00> : vector<8xf32>
    %77 = vector.multi_reduction <add>, %76, %cst_30 [1] : vector<8x16xf32> to vector<8xf32>
    %78 = vector.shape_cast %77 : vector<8xf32> to vector<8x1xf32>
    %cst_31 = arith.constant dense<0.000000e+00> : vector<8x8xf32>
    %79 = tpu.matmul %76, %68, %cst_31 {dimension_numbers = #tpu.dot_dimension_numbers<[1], [0], [0], [1], [0, 0, 1, 1], [], []>, precision = #tpu.contract_precision<fp32>} : vector<8x16xf32>, vector<16x8xf32>, vector<8x8xf32> -> vector<8x8xf32>
    %80 = tpu.reciprocal %78 : vector<8x1xf32> -> vector<8x1xf32>
    %81 = vector.broadcast %80 : vector<8x1xf32> to vector<8x8xf32>
    %82 = arith.mulf %79, %81 : vector<8x8xf32>
    %c0_32 = arith.constant 0 : index
    %c24 = arith.constant 24 : index
    %83 = vector.load %arg8[%c0_32, %c24] : memref<8x32xf32, #tpu.memory_space<vmem>>, vector<8x8xf32>
    tpu.vector_store %arg8[%c0_32, %c24], %82 {strides = array<i32>} : memref<8x32xf32, #tpu.memory_space<vmem>>, vector<8x8xf32>,
    %c0_33 = arith.constant 0 : index
    %c0_34 = arith.constant 0 : index
    %84 = vector.load %arg8[%c0_33, %c0_34] : memref<8x32xf32, #tpu.memory_space<vmem>>, vector<8x32xf32>
    %c0_35 = arith.constant 0 : index
    %c0_36 = arith.constant 0 : index
    %85 = vector.load %arg4[%c0_35, %c0_36] : memref<32x32xf32, #tpu.memory_space<vmem>>, vector<32x32xf32>
    %cst_37 = arith.constant dense<0.000000e+00> : vector<8x32xf32>
    %86 = tpu.matmul %84, %85, %cst_37 {dimension_numbers = #tpu.dot_dimension_numbers<[1], [0], [0], [1], [0, 0, 1, 1], [], []>, precision = #tpu.contract_precision<fp32>} : vector<8x32xf32>, vector<32x32xf32>, vector<8x32xf32> -> vector<8x32xf32>
    %c0_38 = arith.constant 0 : index
    %c0_39 = arith.constant 0 : index
    %87 = vector.load %arg5[%c0_38, %c0_39] : memref<1x32xf32, #tpu.memory_space<vmem>>, vector<1x32xf32>
    %88 = vector.broadcast %87 : vector<1x32xf32> to vector<8x32xf32>
    %89 = arith.addf %86, %88 : vector<8x32xf32>
    %c0_40 = arith.constant 0 : index
    %c0_41 = arith.constant 0 : index
    %c0_42 = arith.constant 0 : index
    %90 = vector.load %arg6[%c0_40, %c0_41, %c0_42] : memref<1x8x32xf32, #tpu.memory_space<vmem>>, vector<1x8x32xf32>
    %91 = vector.shape_cast %90 : vector<1x8x32xf32> to vector<8x32xf32>
    %92 = vector.shape_cast %89 : vector<8x32xf32> to vector<1x8x32xf32>
    tpu.vector_store %arg6[%c0_40, %c0_41, %c0_42], %92 {strides = array<i32>} : memref<1x8x32xf32, #tpu.memory_space<vmem>>, vector<1x8x32xf32>,
    return
  }
  func.func @transform_0(%arg0: i32, %arg1: i32) -> (i32, i32, i32) {
    %c0_i32 = arith.constant 0 : i32
    %c0_i32_0 = arith.constant 0 : i32
    %c0_i32_1 = arith.constant 0 : i32
    return %arg0, %c0_i32, %c0_i32_0 : i32, i32, i32
  }
  func.func @transform_1(%arg0: i32, %arg1: i32) -> (i32, i32) {
    %c0_i32 = arith.constant 0 : i32
    %c0_i32_0 = arith.constant 0 : i32
    %c0_i32_1 = arith.constant 0 : i32
    return %c0_i32, %c0_i32_0 : i32, i32
  }
  func.func @transform_2(%arg0: i32, %arg1: i32) -> (i32, i32) {
    %c0_i32 = arith.constant 0 : i32
    %c0_i32_0 = arith.constant 0 : i32
    %c0_i32_1 = arith.constant 0 : i32
    return %c0_i32, %c0_i32_0 : i32, i32
  }
  func.func @transform_3(%arg0: i32, %arg1: i32) -> (i32, i32) {
    %c0_i32 = arith.constant 0 : i32
    %c0_i32_0 = arith.constant 0 : i32
    %c0_i32_1 = arith.constant 0 : i32
    return %c0_i32, %c0_i32_0 : i32, i32
  }
  func.func @transform_4(%arg0: i32, %arg1: i32) -> (i32, i32, i32) {
    %c0_i32 = arith.constant 0 : i32
    %c0_i32_0 = arith.constant 0 : i32
    return %arg0, %arg1, %c0_i32 : i32, i32, i32
  }
}

</mosaic_0001>

<bundles_post_ra>
// kernel: tpu_custom_call.1
= control target key start
LH: loop header
LB: loop body
LE: loop exit
PB: predicated region body
PF: predicated region fallthrough
CT: control target
= control target key end

     0   :  { %s3122_s0 = inlined_call_operand.hbm [shape: f32[2,16,32], index: 0, kind: input, shape index: {}]   ;;  %s3123_s1 = inlined_call_operand.hbm [shape: f32[32,96], index: 1, kind: input, shape index: {}]   ;;  %s3124_s2 = inlined_call_operand.hbm [shape: f32[32,32], index: 2, kind: input, shape index: {}]   ;;  %s3125_s3 = inlined_call_operand.vmem [shape: f32[1,32], index: 3, kind: input, shape index: {}]   ;;  %s3126_s4 = inlined_call_operand.hbm [shape: f32[2,16,32], index: 4, kind: output, shape index: {}]  }
   0x1   :  { %3137 = sst [smem:[#allocation20_spill]] %s3123_s1 }
   0x2   :  { %3138 = sst [smem:[#allocation21_spill]] %s3124_s2 }
   0x3   :  { %3139 = sst [smem:[#allocation22_spill]] %s3126_s4 }
   0x4   :  { %9 = vsyncpa [#allocation5], 0 }
   0x5   :  { %11 = vsyncpa [#allocation5 + $0x1], 0 }
   0x6   :  { %12 = vsyncpa [#allocation8], 0 }
   0x7   :  { %13 = vsyncpa [#allocation6], 0 }
   0x8   :  { %15 = vsyncpa [#allocation6 + $0x1], 0  ;;  %s2771_s15 = smov 0   ;;  %s2773_s16 = smov 0  }
   0x9   :  { %s2775_s17 = smov 0   ;;  %s2777_s18 = smov 0  }
   0xa   :  { %s2779_s19 = smov 0   ;;  %s2781_s20 = smov 0  }
   0xb   :  { %s2783_s21 = smov 0   ;;  %s2785_s22 = smov 0  }
   0xc   :  { %s2787_s23 = smov 0   ;;  %s2789_s24 = smov 0  }
   0xd   :  { %s2791_s25 = smov 0  }
   0xe LB: > { %3140 = sst [smem:[#allocation14_spill]] %s2686_s15  ;;  %s2324_s26 = sadd.s32 4294967295, %s2726_s25   ;;  %s2726_s25 = sphi %s2791_s25, %s21_s25   ;;  %s2722_s24 = sphi %s2789_s24, %s3170_s24   ;;  %s2718_s23 = sphi %s2787_s23, %s3161_s23   ;;  %s2714_s22 = sphi %s2785_s22, %s3169_s22   ;;  %s2710_s21 = sphi %s2783_s21, %s3160_s21   ;;  %s2706_s20 = sphi %s2781_s20, %s3168_s20   ;;  %s2702_s19 = sphi %s2779_s19, %s3167_s19   ;;  %s2698_s18 = sphi %s2777_s18, %s3166_s18   ;;  %s2694_s17 = sphi %s2775_s17, %s3165_s17   ;;  %s2690_s16 = sphi %s2773_s16, %s3164_s16   ;;  %s2686_s15 = sphi %s2771_s15, %s3163_s15  }
   0xf   : > { %3141 = sst [smem:[#allocation15_spill]] %s2718_s23  ;;  %s2325_s27 = sadd.s32 4294967294, %s2726_s25  }
  0x10   : > { %p53_p0 = scmp.ne.s32.totalorder %s2702_s19, %s2698_s18  ;;  %p2827_p1 = scmp.eq.s32.totalorder %s2324_s26, 0 }
  0x11   : > { %p141_p2 = scmp.ne.s32.totalorder %s2694_s17, %s2690_s16  ;;  %p142_p3 = scmp.eq.s32.totalorder %s2324_s26, 3 }
  0x12   : > { %p2835_p4 = por %p2827_p1, %p53_p0  ;;  %p147_p5 = scmp.ne.s32.totalorder %s2690_s16, %s2686_s15 }
  0x13   : > { %p2841_p6 = por %p142_p3, %p141_p2  ;;  %p148_p7 = scmp.eq.s32.totalorder %s2325_s27, 3 }
  0x14   : > { %p2326_p8 = scmp.ge.s32.totalorder %s2726_s25, 1  ;;  %p155_p9 = scmp.lt.s32.totalorder %s2726_s25, 5 }
  0x15   : > { %s3144_s30 = scalar_select %p2841_p6, 1, 0 }
  0x16   : > { %p2847_p10 = por %p148_p7, %p147_p5  ;;  %p2851_p11 = pnand %p2326_p8, %p155_p9 }
  0x17   : > { %3145 = sst [smem:[#allocation16_spill]] %s3144_s30  ;;  %s2728_s10 = smov [#allocation7]  }
  0x18   : > { %s3146_s5 = scalar_select %p2847_p10, 1, 0 }
  0x19   : > { %s3149_s1 = sld [smem:[#allocation20_spill]]  ;;  %p2366_p12 = pneg %p2851_p11 }
  0x1a   : > { %3147 = sst [smem:[#allocation17_spill]] %s3146_s5  ;;  %s168_s11 = sshll.u32 %s2728_s10, 4  ;;  %s169_s11 = int_to_ptr.vmem [resolvable:$true] %s168_s11 }
  0x1b   : > { %p2367_p13 = pnand %p2366_p12, %p2827_p1  ;;  %s3150_s2 = sld [smem:[#allocation21_spill]] }
  0x1c   : > { %s3127_s18 = smov 128   ;;  %s3128_s26 = smov 8  }
  0x1d   : > { %s2731_s27 = smov [#allocation9]   ;;  %s30_s8 = sadd.s32 1, %s2718_s23 }
  0x1e   : > { %s182_s7 = sshll.u32 %s2731_s27, 4  ;;  %p31_p0 = scmp.ge.s32.totalorder %s30_s8, 2  ;;  %s183_s7 = int_to_ptr.vmem [resolvable:$true] %s182_s7 }
  0x1f   : > { %s166_s9 = sshll.u32 %s3149_s1, 4  ;;  %s33_s10 = sadd.s32 1, %s2722_s24  ;;  %s167_s9 = int_to_ptr.hbm [resolvable:$true] %s166_s9 }
  0x20   : > { %2369 = dma.hbm_to_vmem [thread:$0]  (!%p2367_p13), %s167_s9, 512, %s169_s11, [#allocation8], %s3127_s18, %s3127_s18, %s3128_s26  }
  0x21   : > { %s180_s14 = sshll.u32 %s3150_s2, 4  ;;  %p47_p2 = scmp.ne.s32.totalorder %s2706_s20, %s2702_s19  ;;  %s181_s14 = int_to_ptr.hbm [resolvable:$true] %s180_s14 }
  0x22   : > { %2372 = dma.hbm_to_vmem [thread:$0]  (!%p2367_p13), %s181_s14, 512, %s183_s7, [#allocation8], %s3127_s18, %s3127_s18, %s3128_s26  }
  0x23   : > { %s3172_s8 = smov (%p31_p0, %s30_s8), 0  ;;  %s3174_s10 = smov (!%p31_p0, %s33_s10), %s2722_s24 }
  0x24   : > { %3151 = sst [smem:[#allocation18_spill]] %s3172_s8  ;;  %s40_s9 = sadd.s32 1, %s2706_s20 }
  0x25   : > { %p48_p3 = scmp.eq.s32.totalorder %s2726_s25, 0  ;;  %p35_p5 = scmp.ge.s32.totalorder %s3174_s10, 2 }
  0x26   : > { %s127_s11 = ssub.s32 %s2718_s23, %s3172_s8  ;;  %s131_s13 = sadd.s32 1, %s2694_s17 }
  0x27   : > { %p2882_p7 = por %p48_p3, %p47_p2  ;;  %s3176_s10 = smov (%p35_p5, %s3174_s10), 0 }
  0x28   : > { %3153 = sst [smem:[#allocation19_spill]] %s3176_s10  ;;  %p2383_p8 = scmp.lt.s32.totalorder %s2726_s25, 4 }
  0x29   : > { %s199_s14 = sand.u32 1, %s2706_s20   ;;  %s37_s27 = ssub.s32 %s2722_s24, %s3176_s10 }
  0x2a   : > { %s2345_s7 = sshll.u32 %s2722_s24, 4  ;;  %p38_p9 = scmp.eq.s32.totalorder %s37_s27, 0 }
  0x2b   : > { %s128_s18 = sor.u32 %s127_s11, %s37_s27  ;;  %s2330_s26 = sshll.u32 %s199_s14, 4 }
  0x2c   : > { %p129_p12 = scmp.eq.s32.totalorder %s128_s18, 0  ;;  %s208_s5 = scalar_lea.hbm %s3122_s0, %s2345_s7 }
  0x2d   : > { %s2895_s1 = scalar_select %p38_p9, %s2706_s20, %s40_s9  }
  0x2e   : > { %s2898_s2 = scalar_select %p129_p12, %s2694_s17, %s131_s13  }
  0x2f   : > { %s209_s15 = sshll.u32 %s208_s5, 4  ;;  %s203_s30 = scalar_lea.vmem [#allocation4], %s2330_s26  ;;  %s210_s15 = int_to_ptr.hbm [resolvable:$true] %s209_s15 }
  0x30   : > { %s211_s4 = sshll.u32 %s203_s30, 4  ;;  %p2374_p13 = pnand %p2383_p8, %p2882_p7  ;;  %s212_s4 = int_to_ptr.vmem [resolvable:$true] %s211_s4 }
  0x31   : > { %s200_s10 = scalar_lea.sflag [#allocation5], %s199_s14  ;;  %s3154_s11 = smov 8  }
  0x32   : > { %s3155_s18 = smov 128   ;;  %223 = sbr.rel (%p2851_p11) target bundleno = 1957 (0x7a5), region = 36 }
  0x33   : > { %2376 = dma.hbm_to_vmem [thread:$0]  (!%p2374_p13), %s210_s15, 256, %s212_s4, %s200_s10, %s3155_s18, %s3155_s18, %s3154_s11  }
  0x34   : > { %s225_s23 = sand.u32 (!%p2851_p11), 1, %s2702_s19  }
  0x35   : > { %s2334_s8 = sshll.u32 (!%p2851_p11), %s225_s23, 4  ;;  %s226_s5 = scalar_lea.sflag (!%p2851_p11), [#allocation5], %s225_s23 }
  0x36   : > { %s229_s26 = scalar_lea.vmem (!%p2851_p11), [#allocation4], %s2334_s8 }
  0x37   : > { %2673 = dma.done.wait (%p2835_p4), %s226_s5, 256  }
  0x38   : > { %2675 = vsyncadd (%p2835_p4), %s226_s5, 4294967040 }
  0x39   : > { %2677 = dma.done.wait (%p2827_p1), [#allocation8], 1024  }
  0x3a   : > { %2679 = vsyncadd (%p2827_p1), [#allocation8], 4294966272  ;;  %s262_s4 = sand.u32 1, %s2690_s16   ;;  %p2338_p11 = scmp.ne.s32.totalorder %s2710_s21, 0 }
  0x3b   : > { %s2924_s15 = sshll.u32 %s262_s4, 3 }
  0x3c   : > { %s264_s30 = scalar_lea.vmem [#allocation10], %s2924_s15  ;;  %268 = sbr.rel (%p2338_p11) target bundleno = 239 (0xef), region = 52 }
  0x41   : > { %v274_v0 = vld [vmem:[#allocation7 + $0x18] sm:$0xff]  ;;  %v273_v1 = vld [vmem:[#allocation7 + $0x10] sm:$0xff]  ;;  %v272_v2 = vld [vmem:[#allocation7 + $0x8] sm:$0xff]  ;;  %vm275_vm0 = vcmask 261120   ;;  %vm498_vm1 = vcmask 785408  }
  0x42   : > { %v294_v3 = vand.u32 4294901760, %v274_v0  ;;  %v2928_v4 = vand.u32 4294901760, %v273_v1  ;;  %v2930_v5 = vand.u32 4294901760, %v272_v2  ;;  %v271_v6 = vld [vmem:[#allocation7] sm:$0xff]  ;;  %v270_v7 = vld [vmem:[%s229_s26 + $0x8] sm:$0xff] }
  0x43   : > { %v269_v8 = vld [vmem:[%s229_s26] sm:$0xff]  ;;  %v2932_v9 = vand.u32 4294901760, %v271_v6  ;;  %v280_v10 = vsel %vm275_vm0, %v270_v7, 0 }
  0x44   : > { %v277_v11 = vsel %vm275_vm0, %v269_v8, 0  ;;  %2346 = vmatpush.msra.mxu2 %v294_v3  ;;  %v332_v12 = vsub.f32 %v274_v0, %v294_v3  ;;  %v2934_v13 = vand.u32 4294901760, %v280_v10  ;;  %v338_v14 = vsub.f32 %v273_v1, %v2928_v4  ;;  %295 = vmatpush.msra.mxu0 %v294_v3 }
  0x45   : > { %v344_v15 = vsub.f32 %v272_v2, %v2930_v5  ;;  %v350_v16 = vsub.f32 %v271_v6, %v2932_v9  ;;  %v302_v17 = vand.u32 4294901760, %v277_v11 }
  0x46   : > { %2347 = vmatpush.msra.mxu2 %v2928_v4  ;;  %v333_v18 = vand.u32 4294901760, %v332_v12  ;;  %v311_v19 = vsub.f32 %v280_v10, %v2934_v13  ;;  %v339_v20 = vand.u32 4294901760, %v338_v14  ;;  %297 = vmatpush.msra.mxu0 %v2928_v4 }
  0x47   : > { %v345_v21 = vand.u32 4294901760, %v344_v15  ;;  %v351_v22 = vand.u32 4294901760, %v350_v16  ;;  %v303_v23 = vsub.f32 %v277_v11, %v302_v17 }
  0x48   : > { %2348 = vmatpush.msra.mxu2 %v2930_v5  ;;  %v334_v24 = vsub.f32 %v332_v12, %v333_v18  ;;  %v312_v25 = vand.u32 4294901760, %v311_v19  ;;  %v340_v26 = vsub.f32 %v338_v14, %v339_v20  ;;  %299 = vmatpush.msra.mxu0 %v2930_v5 }
  0x49   : > { %v346_v27 = vsub.f32 %v344_v15, %v345_v21  ;;  %v304_v28 = vand.u32 4294901760, %v303_v23  ;;  %v352_v32 = vsub.f32 %v350_v16, %v351_v22 }
  0x4a   : > { %2349 = vmatpush.msra.mxu2 %v2932_v9  ;;  %v335_v29 = vand.u32 4294901760, %v334_v24  ;;  %v313_v30 = vsub.f32 %v311_v19, %v312_v25  ;;  %v341_v31 = vand.u32 4294901760, %v340_v26  ;;  %301 = vmatpush.msra.mxu0 %v2932_v9 }
  0x4b   : > { %v305_v33 = vsub.f32 %v303_v23, %v304_v28  ;;  %v347_v35 = vand.u32 4294901760, %v346_v27  ;;  %v353_v37 = vand.u32 4294901760, %v352_v32 }
  0x4c   : > { %378 = vmatpush.msrb.mxu2 %v332_v12  ;;  %447 = vmatpush.msrb.mxu0 %v333_v18  ;;  %v314_v34 = vand.u32 4294901760, %v313_v30 }
  0x4d   : > { %2350 = vmatpush.msra.mxu3 %v335_v29  ;;  %336 = vmatpush.msra.mxu1 %v335_v29  ;;  %v306_v36 = vand.u32 4294901760, %v305_v33 }
  0x4e   : > { %381 = vmatpush.msrb.mxu2 %v338_v14  ;;  %451 = vmatpush.msrb.mxu0 %v339_v20 }
  0x4f   : > { %315 = vmatmul.f32.vlgmr.msra.gmra.mxu2 %v314_v34  ;;  %2351 = vmatpush.msra.mxu3 %v341_v31 }
  0x50   : > { %384 = vmatpush.msrb.mxu2 %v344_v15  ;;  %342 = vmatpush.msra.mxu1 %v341_v31 }
  0x51   : > { %2352 = vmatpush.msra.mxu3 %v347_v35  ;;  %307 = vmatmul.f32.vlgmr.msra.gmra.mxu0 %v306_v36 }
  0x52   : > { %387 = vmatpush.msrb.mxu2 %v350_v16  ;;  %348 = vmatpush.msra.mxu1 %v347_v35 }
  0x53   : > { %2353 = vmatpush.msra.mxu3 %v353_v37  ;;  %455 = vmatpush.msrb.mxu0 %v345_v21 }
  0x54   : > { %360 = vmatmul.f32.vlgmr.msra.gmra.mxu3 %v2934_v13  ;;  %354 = vmatpush.msra.mxu1 %v353_v37 }
  0x55   : > { %412 = vmatpush.msrb.mxu3 %v294_v3  ;;  %356 = vmatmul.f32.vlgmr.msra.gmra.mxu1 %v302_v17 }
  0x56   : > { %482 = vmatpush.msrb.mxu1 %v294_v3  ;;  %459 = vmatpush.msrb.mxu0 %v351_v22 }
  0x57   : > { %390 = vmatmul.f32.vlgmr.msrb.gmra.mxu2 %v303_v23  ;;  %414 = vmatpush.msrb.mxu3 %v2928_v4 }
  0x58   : > { %484 = vmatpush.msrb.mxu1 %v2928_v4 }
  0x59   : > { %416 = vmatpush.msrb.mxu3 %v2930_v5  ;;  %461 = vmatmul.f32.vlgmr.msrb.gmra.mxu0 %v302_v17 }
  0x5a   : > { %486 = vmatpush.msrb.mxu1 %v2930_v5 }
  0x5b   : > { %418 = vmatpush.msrb.mxu3 %v2932_v9 }
  0x5c   : > { %422 = vmatmul.f32.vlgmr.msrb.gmra.mxu3 %v304_v28  ;;  %488 = vmatpush.msrb.mxu1 %v2932_v9 }
  0x5d   : > { %490 = vmatmul.f32.vlgmr.msrb.gmra.mxu1 %v302_v17 }
  0x5f   : > { %395 = vmatmul.f32.gmra.mxu2 %v311_v19 }
  0x61   : > { %465 = vmatmul.f32.gmra.mxu0 %v2934_v13 }
  0x64   : > { %428 = vmatmul.f32.gmra.mxu3 %v312_v25 }
  0x65   : > { %494 = vmatmul.f32.gmra.mxu1 %v2934_v13 }
  0xce   : > { %v308_v39 = vpop.f32.mrf.mxu0 }
  0xd2   : > { %v316_v38 = vpop.f32.mrf.mxu2  ;;  %v357_v41 = vpop.f32.mrf.mxu1 }
  0xd3   : > { %v358_v42 = vadd.f32 %v357_v41, %v308_v39 }
  0xd6   : > { %v462_v44 = vpop.f32.mrf.mxu0 }
  0xd7   : > { %v361_v40 = vpop.f32.mrf.mxu3 }
  0xd8   : > { %v362_v51 = vadd.f32 %v361_v40, %v316_v38 }
  0xda   : > { %v391_v43 = vpop.f32.mrf.mxu2  ;;  %v491_v47 = vpop.f32.mrf.mxu1 }
  0xdb   : > { %v392_v45 = vadd.f32 %v391_v43, %v358_v42 }
  0xde   : > { %v466_v55 = vpop.f32.mrf.mxu0 }
  0xdf   : > { %v423_v46 = vpop.f32.mrf.mxu3 }
  0xe0   : > { %v424_v48 = vadd.f32 %v423_v46, %v392_v45 }
  0xe2   : > { %v463_v49 = vadd.f32 %v462_v44, %v424_v48  ;;  %v396_v50 = vpop.f32.mrf.mxu2  ;;  %v495_v57 = vpop.f32.mrf.mxu1 }
  0xe3   : > { %v397_v53 = vadd.f32 %v396_v50, %v362_v51 }
  0xe4   : > { %v492_v52 = vadd.f32 %v491_v47, %v463_v49 }
  0xe6   : > { %499 = vst.msk [vmem:[#allocation2] sm:$0xff] %vm498_vm1, %v492_v52 }
  0xe7   : > { %v429_v54 = vpop.f32.mrf.mxu3 }
  0xe8   : > { %v430_v56 = vadd.f32 %v429_v54, %v397_v53 }
  0xea   : > { %v467_v58 = vadd.f32 %v466_v55, %v430_v56 }
  0xec   : > { %v496_v59 = vadd.f32 %v495_v57, %v467_v58 }
  0xee   : > { %500 = vst.msk [vmem:[#allocation2 + $0x8] sm:$0xff] %vm498_vm1, %v496_v59 }
  0xef PF: > { %s2732_s28 = smov 96   ;;  %v2958_v61 = vld [vmem:[#allocation2] sm:$0xff]  ;;  %s2339_s29 = sshll.u32 %s2710_s21, 3  ;;  %vm519_vm2 = vcmask 64512   ;;  %v502_v20 = vlaneseq  ;;  %vm687_vm4 = vcmask 130048   ;;  %vm1253_vm1 = vcmask 130112  }
  0xf0   : > { %s509_s6 = scalar_lea.vmem [#allocation2], %s2339_s29  ;;  %s2733_s10 = smov 64   ;;  %v504_v25 = vstv %s2339_s29 }
  0xf1   : > { %697 = vrot.lane.b32.xlu2 %v2958_v61, %s2733_s10  ;;  %s2734_s9 = smov 88   ;;  %s2735_s12 = smov 120   ;;  %v503_v23 = vshrl.u32 %v502_v20, 7  ;;  %v2978_v30 = vand.u32 127, %v502_v20 }
  0xf2   : > { %s2736_s13 = smov 80   ;;  %s2737_s14 = smov 56  }
  0xf3   : > { %v2976_v29 = vadd.s32 %v504_v25, %v503_v23  ;;  %s2738_s27 = smov 112   ;;  %s2739_s7 = smov 72  }
  0xf4   : > { %s2740_s11 = smov 40   ;;  %s2741_s18 = smov 48  }
  0xf5   : > { %v2955_v60 = vld [vmem:[#allocation2 + $0x8] sm:$0xff]  ;;  %v2964_v62 = vld [vmem:[%s509_s6] sm:$0xff]  ;;  %vm508_vm3 = vcmp.ge.s32.totalorder %v2976_v29, %v2978_v30  ;;  %s2742_s23 = smov 104   ;;  %s2743_s8 = smov 8  }
  0xf6   : > { %517 = vrot.lane.b32.xlu0 %v2955_v60, %s2732_s28  ;;  %v521_v63 = vsel %vm519_vm2, %v2964_v62, 0  ;;  %s2744_s5 = smov 16   ;;  %s2745_s26 = smov 24  }
  0xf7   : > { %v545_v0 = vand.u32 4294901760, %v521_v63 }
  0xf9   : > { %v546_v1 = vsub.f32 %v521_v63, %v545_v0  ;;  %889 = vrot.lane.b32.xlu2 %v2955_v60, %s2734_s9 }
  0xfb   : > { %v547_v5 = vand.u32 4294901760, %v546_v1 }
  0xfd   : > { %v548_v8 = vsub.f32 %v546_v1, %v547_v5 }
  0xfe   : > { %515 = vrot.lane.b32.xlu0 %v2958_v61, %s2732_s28  ;;  %s2341_s28 = sshll.u32 %s2714_s22, 1 }
  0xff   : > { %v549_v14 = vand.u32 4294901760, %v548_v8 }
 0x101   : > { %883 = vrot.lane.b32.xlu2 %v2964_v62, %s2735_s12 }
 0x106   : > { %887 = vrot.lane.b32.xlu0 %v2958_v61, %s2734_s9 }
 0x109   : > { %1068 = vrot.lane.b32.xlu2 %v2955_v60, %s2737_s14 }
 0x111   : > { %1066 = vrot.lane.b32.xlu2 %v2958_v61, %s2737_s14  ;;  %s3156_s14 = sld [smem:[#allocation22_spill]] }
 0x119   : > { %1261 = vrot.lane.b32.xlu2 %v2958_v61, %s2736_s13 }
 0x14b   : > { %v698_v37 = vpop.permute.xlu2 %697 }
 0x14c   : > { %v722_v53 = vand.u32 4294901760, %v698_v37 }
 0x14e   : > { %v754_v58 = vsub.f32 %v698_v37, %v722_v53 }
 0x153   : > { %v890_v41 = vpop.permute.xlu2 %889 }
 0x154   : > { %v895_v42 = vsel %vm519_vm2, %v890_v41, 0 }
 0x155   : > { %v911_v46 = vand.u32 4294901760, %v895_v42 }
 0x157   : > { %v939_v51 = vsub.f32 %v895_v42, %v911_v46 }
 0x159   : > { %v940_v57 = vand.u32 4294901760, %v939_v51 }
 0x15b   : > { %v884_v48 = vpop.permute.xlu2 %883 }
 0x15c   : > { %v891_v52 = vsel %vm519_vm2, %v884_v48, 0 }
 0x15d   : > { %v915_v56 = vand.u32 4294901760, %v891_v52 }
 0x168   : > { %v518_v2 = vpop.permute.xlu0 %517 }
 0x169   : > { %v525_v3 = vsel %vm519_vm2, %v518_v2, 0  ;;  %v941_v2 = vsub.f32 %v939_v51, %v940_v57 }
 0x16a   : > { %v541_v4 = vand.u32 4294901760, %v525_v3 }
 0x16c   : > { %v569_v6 = vsub.f32 %v525_v3, %v541_v4  ;;  %542 = vmatpush.xpose.msra.mxu0 %v541_v4  ;;  %626 = vmatpush.xpose.msra.mxu3 %v541_v4 }
 0x16e   : > { %601 = vmatpush.xpose.msra.mxu2 %v569_v6  ;;  %v570_v7 = vand.u32 4294901760, %v569_v6 }
 0x170   : > { %v516_v9 = vpop.permute.xlu0 %515  ;;  %v571_v10 = vsub.f32 %v569_v6, %v570_v7  ;;  %v755_v6 = vand.u32 4294901760, %v754_v58 }
 0x171   : > { %v523_v11 = vsel %vm519_vm2, %v516_v9, 0  ;;  %v942_v9 = vand.u32 4294901760, %v941_v2 }
 0x172   : > { %v543_v12 = vand.u32 4294901760, %v523_v11  ;;  %v572_v13 = vand.u32 4294901760, %v571_v10 }
 0x174   : > { %v575_v15 = vsub.f32 %v523_v11, %v543_v12  ;;  %544 = vmatpush.xpose.msra.mxu0 %v543_v12  ;;  %573 = vmatpush.xpose.msra.mxu1 %v572_v13 }
 0x175   : > { %628 = vmatpush.xpose.msra.mxu3 %v543_v12 }
 0x176   : > { %604 = vmatpush.xpose.msra.mxu2 %v575_v15  ;;  %v576_v16 = vand.u32 4294901760, %v575_v15 }
 0x177   : > { %550 = vmatmul.f32.vlgmr.msra.gmra.mxu0 %v549_v14 }
 0x178   : > { %653 = vmatpush.xpose.msrb.mxu0 %v570_v7  ;;  %v577_v17 = vsub.f32 %v575_v15, %v576_v16  ;;  %632 = vmatmul.f32.vlgmr.msra.gmra.mxu3 %v547_v5  ;;  %v888_v47 = vpop.permute.xlu0 %887 }
 0x179   : > { %607 = vmatmul.f32.vlgmr.msra.gmra.mxu2 %v546_v1  ;;  %v893_v49 = vsel %vm519_vm2, %v888_v47, 0  ;;  %v916_v1 = vsub.f32 %v891_v52, %v915_v56 }
 0x17a   : > { %v578_v18 = vand.u32 4294901760, %v577_v17  ;;  %v913_v54 = vand.u32 4294901760, %v893_v49 }
 0x17b   : > { %v917_v8 = vand.u32 4294901760, %v916_v1 }
 0x17c   : > { %657 = vmatpush.xpose.msrb.mxu0 %v576_v16  ;;  %579 = vmatpush.xpose.msra.mxu1 %v578_v18  ;;  %v945_v59 = vsub.f32 %v893_v49, %v913_v54 }
 0x17d   : > { %v918_v14 = vsub.f32 %v916_v1, %v917_v8 }
 0x17e   : > { %v946_v5 = vand.u32 4294901760, %v945_v59 }
 0x17f   : > { %581 = vmatmul.f32.vlgmr.msra.gmra.mxu1 %v545_v0  ;;  %659 = vmatmul.f32.vlgmr.msrb.gmra.mxu0 %v545_v0  ;;  %v919_v18 = vand.u32 4294901760, %v918_v14 }
 0x180   : > { %678 = vmatpush.xpose.msrb.mxu1 %v541_v4  ;;  %v947_v13 = vsub.f32 %v945_v59, %v946_v5 }
 0x182   : > { %v948_v17 = vand.u32 4294901760, %v947_v13 }
 0x184   : > { %680 = vmatpush.xpose.msrb.mxu1 %v543_v12  ;;  %v756_v12 = vsub.f32 %v754_v58, %v755_v6 }
 0x186   : > { %v757_v16 = vand.u32 4294901760, %v756_v12 }
 0x187   : > { %682 = vmatmul.f32.vlgmr.msrb.gmra.mxu1 %v545_v0 }
 0x1f4   : > { %v551_v19 = vpop.f32.mrf.mxu0 }
 0x1fb   : > { %v633_v26 = vpop.f32.mrf.mxu3 }
 0x1fc   : > { %v582_v21 = vpop.f32.mrf.mxu1  ;;  %v608_v22 = vpop.f32.mrf.mxu2 }
 0x1fd   : > { %v583_v24 = vadd.f32 %v582_v21, %v551_v19  ;;  %v660_v28 = vpop.f32.mrf.mxu0 }
 0x1ff   : > { %v609_v27 = vadd.f32 %v608_v22, %v583_v24 }
 0x201   : > { %v634_v31 = vadd.f32 %v633_v26, %v609_v27 }
 0x203   : > { %v661_v32 = vadd.f32 %v660_v28, %v634_v31 }
 0x204   : > { %v683_v33 = vpop.f32.mrf.mxu1 }
 0x205   : > { %v684_v34 = vadd.f32 %v683_v33, %v661_v32 }
 0x207   : > { %v686_v35 = vsel %vm508_vm3, %v684_v34, -1e+30 }
 0x208   : > { %v688_v36 = vsel %vm687_vm4, %v686_v35, -inf }
 0x209   : > { %689 = vmax.xlane.f32.xlu1 %v688_v36 }
 0x222   : > { %699 = vrot.lane.b32.xlu1 %v2955_v60, %s2733_s10  ;;  %s2213_s10 = sadd.s32 %s2710_s21, %s2341_s28 }
 0x223   : > { %s2342_s9 = sshll.u32 %s2213_s10, 3 }
 0x22a   : > { %1263 = vrot.lane.b32.xlu1 %v2955_v60, %s2736_s13 }
 0x232   : > { %1257 = vrot.lane.b32.xlu1 %v2964_v62, %s2738_s27  ;;  %s2215_s27 = scalar_lea.hbm %s3156_s14, %s2342_s9 }
 0x233   : > { %s2219_s21 = sshll.u32 %s2215_s27, 4  ;;  %s2220_s21 = int_to_ptr.hbm [resolvable:$true] %s2219_s21 }
 0x23a   : > { %1442 = vrot.lane.b32.xlu1 %v2955_v60, %s2741_s18 }
 0x242   : > { %1440 = vrot.lane.b32.xlu1 %v2958_v61, %s2741_s18  ;;  %s2614_s18 = sshra.s32 %s2220_s21, 4  ;;  %s2615_s18 = int_to_ptr.hbm [resolvable:$true] %s2614_s18 }
 0x243   : > { %p2621_p2 = scmp.lt.s32.totalorder %s2615_s18, %s3156_s14 }
 0x24a   : > { %1637 = vrot.lane.b32.xlu1 %v2955_v60, %s2739_s7 }
 0x252   : > { %1631 = vrot.lane.b32.xlu1 %v2964_v62, %s2742_s23  ;;  %s2616_s23 = scalar_lea.hbm %s2615_s18, 8 }
 0x253   : > { %p2617_p1 = scmp.ne.s32.totalorder %s2615_s18, %s2616_s23 }
 0x255   : > { %p2618_p4 = pnand %p2617_p1, %p2841_p6 }
 0x257   : > { %p2619_p0 = pneg %p2618_p4 }
 0x27c   : > { %v690_v38 = vpop.xlane.xlu1 %689 }
 0x27d   : > { %v691_v39 = vsub.f32 %v686_v35, %v690_v38 }
 0x27f   : > { %v692_v40 = vmul.f32 1.442695, %v691_v39 }
 0x281   : > { %2494 = vpow2.f32 %v692_v40 }
 0x287   : > { %v2988_v43 = vpop.eup %2494 }
 0x288   : > { %v704_v44 = vsel %vm687_vm4, %v2988_v43, 0 }
 0x289   : > { %v2992_v45 = vand.u32 4294901760, %v704_v44 }
 0x28b   : > { %v725_v50 = vsub.f32 %v704_v44, %v2992_v45  ;;  %v1069_v44 = vpop.permute.xlu2 %1068 }
 0x28d   : > { %v726_v55 = vand.u32 4294901760, %v725_v50 }
 0x28f   : > { %v727_v0 = vsub.f32 %v725_v50, %v726_v55 }
 0x291   : > { %v728_v7 = vand.u32 4294901760, %v727_v0 }
 0x294   : > { %v700_v63 = vpop.permute.xlu1 %699 }
 0x295   : > { %v720_v3 = vand.u32 4294901760, %v700_v63 }
 0x297   : > { %v748_v4 = vsub.f32 %v700_v63, %v720_v3  ;;  %721 = vmatpush.msrb.mxu2 %v720_v3  ;;  %805 = vmatpush.msra.mxu1 %v720_v3 }
 0x299   : > { %v749_v10 = vand.u32 4294901760, %v748_v4  ;;  %723 = vmatpush.msrb.mxu2 %v722_v53  ;;  %780 = vmatpush.msra.mxu0 %v748_v4 }
 0x29a   : > { %807 = vmatpush.msra.mxu1 %v722_v53  ;;  %729 = vmatmul.f32.vlgmr.msrb.gmra.mxu2 %v728_v7 }
 0x29b   : > { %811 = vmatmul.f32.vlgmr.msra.gmra.mxu1 %v726_v55  ;;  %783 = vmatpush.msra.mxu0 %v754_v58  ;;  %v750_v11 = vsub.f32 %v748_v4, %v749_v10 }
 0x29c   : > { %832 = vmatpush.msra.mxu2 %v749_v10  ;;  %786 = vmatmul.f32.vlgmr.msra.gmra.mxu0 %v725_v50 }
 0x29d   : > { %v751_v15 = vand.u32 4294901760, %v750_v11  ;;  %912 = vmatpush.xpose.msrb.mxu0 %v911_v46  ;;  %943 = vmatpush.xpose.msrb.mxu1 %v942_v9 }
 0x29e   : > { %836 = vmatpush.msra.mxu2 %v755_v6 }
 0x29f   : > { %752 = vmatpush.msrb.mxu3 %v751_v15 }
 0x2a0   : > { %971 = vmatpush.xpose.msrb.mxu2 %v939_v51  ;;  %v1067_v51 = vpop.permute.xlu2 %1066 }
 0x2a1   : > { %758 = vmatpush.msrb.mxu3 %v757_v16  ;;  %914 = vmatpush.xpose.msrb.mxu0 %v913_v54 }
 0x2a2   : > { %760 = vmatmul.f32.vlgmr.msrb.gmra.mxu3 %v2992_v45  ;;  %838 = vmatmul.f32.vlgmr.msra.gmra.mxu2 %v2992_v45 }
 0x2a3   : > { %857 = vmatpush.msra.mxu3 %v720_v3  ;;  %949 = vmatpush.xpose.msrb.mxu1 %v948_v17 }
 0x2a4   : > { %920 = vmatmul.f32.vlgmr.msrb.gmra.mxu0 %v919_v18  ;;  %974 = vmatpush.xpose.msrb.mxu2 %v945_v59 }
 0x2a5   : > { %859 = vmatpush.msra.mxu3 %v722_v53  ;;  %1023 = vmatpush.xpose.msra.mxu0 %v940_v57  ;;  %v1091_v53 = vand.u32 4294901760, %v1067_v51  ;;  %v1264_v57 = vpop.permute.xlu1 %1263 }
 0x2a6   : > { %951 = vmatmul.f32.vlgmr.msrb.gmra.mxu1 %v915_v56  ;;  %v1269_v58 = vsel %vm519_vm2, %v1264_v57, 0 }
 0x2a7   : > { %1048 = vmatpush.xpose.msra.mxu1 %v911_v46  ;;  %996 = vmatpush.xpose.msrb.mxu3 %v911_v46  ;;  %v1285_v63 = vand.u32 4294901760, %v1269_v58 }
 0x2a8   : > { %v1262_v3 = vpop.permute.xlu2 %1261 }
 0x2a9   : > { %1027 = vmatpush.xpose.msra.mxu0 %v946_v5  ;;  %v1313_v0 = vsub.f32 %v1269_v58, %v1285_v63  ;;  %v1267_v4 = vsel %vm519_vm2, %v1262_v3, 0 }
 0x2aa   : > { %861 = vmatmul.f32.vlgmr.msra.gmra.mxu3 %v2992_v45  ;;  %977 = vmatmul.f32.vlgmr.msrb.gmra.mxu2 %v916_v1  ;;  %v1089_v45 = vand.u32 4294901760, %v1069_v44  ;;  %v1287_v6 = vand.u32 4294901760, %v1267_v4 }
 0x2ab   : > { %1050 = vmatpush.xpose.msra.mxu1 %v913_v54  ;;  %998 = vmatpush.xpose.msrb.mxu3 %v913_v54  ;;  %v1123_v54 = vsub.f32 %v1067_v51, %v1091_v53  ;;  %v1314_v1 = vand.u32 4294901760, %v1313_v0 }
 0x2ac   : > { %1029 = vmatmul.f32.vlgmr.msra.gmra.mxu0 %v915_v56  ;;  %v1117_v48 = vsub.f32 %v1069_v44, %v1089_v45  ;;  %1090 = vmatpush.msra.mxu2 %v1089_v45  ;;  %v1319_v7 = vsub.f32 %v1267_v4, %v1287_v6 }
 0x2ad   : > { %v1124_v55 = vand.u32 4294901760, %v1123_v54  ;;  %v1315_v2 = vsub.f32 %v1313_v0, %v1314_v1  ;;  %v1258_v11 = vpop.permute.xlu1 %1257 }
 0x2ae   : > { %1052 = vmatmul.f32.vlgmr.msra.gmra.mxu1 %v915_v56  ;;  %v1118_v49 = vand.u32 4294901760, %v1117_v48  ;;  %1149 = vmatpush.msrb.mxu0 %v1117_v48  ;;  %v1265_v14 = vsel %vm519_vm2, %v1258_v11, 0 }
 0x2af   : > { %1174 = vmatpush.msrb.mxu1 %v1089_v45  ;;  %1092 = vmatpush.msra.mxu2 %v1091_v53  ;;  %v1125_v56 = vsub.f32 %v1123_v54, %v1124_v55  ;;  %v1316_v5 = vand.u32 4294901760, %v1315_v2  ;;  %v1289_v16 = vand.u32 4294901760, %v1265_v14 }
 0x2b0   : > { %v1119_v50 = vsub.f32 %v1117_v48, %v1118_v49  ;;  %1152 = vmatpush.msrb.mxu0 %v1123_v54 }
 0x2b1   : > { %1201 = vmatpush.msrb.mxu2 %v1118_v49  ;;  %1176 = vmatpush.msrb.mxu1 %v1091_v53  ;;  %v1126_v59 = vand.u32 4294901760, %v1125_v56  ;;  %v1290_v17 = vsub.f32 %v1265_v14, %v1289_v16 }
 0x2b2   : > { %1002 = vmatmul.f32.vlgmr.msrb.gmra.mxu3 %v917_v8  ;;  %v1120_v52 = vand.u32 4294901760, %v1119_v50  ;;  %1286 = vmatpush.xpose.msra.mxu0 %v1285_v63  ;;  %v1320_v8 = vand.u32 4294901760, %v1319_v7 }
 0x2b3   : > { %1205 = vmatpush.msrb.mxu2 %v1124_v55  ;;  %1317 = vmatpush.xpose.msra.mxu1 %v1316_v5 }
 0x2b4   : > { %1121 = vmatpush.msra.mxu3 %v1120_v52  ;;  %v1321_v9 = vsub.f32 %v1319_v7, %v1320_v8 }
 0x2b6   : > { %1127 = vmatpush.msra.mxu3 %v1126_v59  ;;  %1288 = vmatpush.xpose.msra.mxu0 %v1287_v6  ;;  %v1322_v10 = vand.u32 4294901760, %v1321_v9 }
 0x2b8   : > { %1226 = vmatpush.msrb.mxu3 %v1089_v45  ;;  %1323 = vmatpush.xpose.msra.mxu1 %v1322_v10 }
 0x2ba   : > { %1228 = vmatpush.msrb.mxu3 %v1091_v53 }
 0x318   : > { %v812_v21 = vpop.f32.mrf.mxu1 }
 0x319   : > { %v787_v20 = vpop.f32.mrf.mxu0 }
 0x31d   : > { %v730_v19 = vpop.f32.mrf.mxu2 }
 0x321   : > { %v921_v28 = vpop.f32.mrf.mxu0 }
 0x323   : > { %v952_v33 = vpop.f32.mrf.mxu1 }
 0x324   : > { %v953_v35 = vadd.f32 %v952_v33, %v921_v28 }
 0x325   : > { %v761_v22 = vpop.f32.mrf.mxu3  ;;  %v839_v24 = vpop.f32.mrf.mxu2 }
 0x326   : > { %v762_v23 = vadd.f32 %v761_v22, %v730_v19  ;;  %v1291_v22 = vand.u32 4294901760, %v1290_v17 }
 0x328   : > { %v788_v25 = vadd.f32 %v787_v20, %v762_v23 }
 0x329   : > { %v1030_v39 = vpop.f32.mrf.mxu0 }
 0x32a   : > { %v813_v26 = vadd.f32 %v812_v21, %v788_v25 }
 0x32b   : > { %v1053_v41 = vpop.f32.mrf.mxu1 }
 0x32c   : > { %v840_v27 = vadd.f32 %v839_v24, %v813_v26  ;;  %v1292_v24 = vsub.f32 %v1290_v17, %v1291_v22 }
 0x32d   : > { %v862_v31 = vpop.f32.mrf.mxu3  ;;  %v978_v34 = vpop.f32.mrf.mxu2 }
 0x32e   : > { %v3005_v32 = vadd.f32 %v862_v31, %v840_v27  ;;  %v979_v36 = vadd.f32 %v978_v34, %v953_v35  ;;  %v1293_v27 = vand.u32 4294901760, %v1292_v24 }
 0x335   : > { %v1003_v37 = vpop.f32.mrf.mxu3 }
 0x336   : > { %v1004_v38 = vadd.f32 %v1003_v37, %v979_v36 }
 0x338   : > { %v1031_v40 = vadd.f32 %v1030_v39, %v1004_v38 }
 0x33a   : > { %v1054_v42 = vadd.f32 %v1053_v41, %v1031_v40 }
 0x33c   : > { %v1056_v46 = vsel %vm508_vm3, %v1054_v42, -1e+30 }
 0x33d   : > { %v1057_v47 = vsel %vm687_vm4, %v1056_v46, -inf }
 0x33e   : > { %1058 = vmax.xlane.f32.xlu0 %v1057_v47 }
 0x352   : > { %1635 = vrot.lane.b32.xlu0 %v2958_v61, %s2739_s7  ;;  %s2217_s7 = sshll.u32 %s264_s30, 4  ;;  %s2218_s7 = int_to_ptr.vmem [resolvable:$true] %s2217_s7 }
 0x35a   : > { %1816 = vrot.lane.b32.xlu0 %v2955_v60, %s2740_s11 }
 0x3b1   : > { %v1059_v12 = vpop.xlane.xlu0 %1058 }
 0x3b2   : > { %v1060_v13 = vsub.f32 %v1056_v46, %v1059_v12 }
 0x3b4   : > { %v1061_v15 = vmul.f32 1.442695, %v1060_v13 }
 0x3b6   : > { %2496 = vpow2.f32 %v1061_v15 }
 0x3bc   : > { %v2497_v18 = vpop.eup %2496 }
 0x3bd   : > { %v1063_v19 = vsel %vm687_vm4, %v2497_v18, 0.0  ;;  %v1073_v20 = vsel %vm687_vm4, %v2497_v18, 0 }
 0x3be   : > { %1064 = vadd.xlane.f32.xlu0 %v1063_v19  ;;  %v1093_v21 = vand.u32 4294901760, %v1073_v20 }
 0x3c0   : > { %1129 = vmatmul.f32.vlgmr.msra.gmra.mxu3 %v1093_v21  ;;  %v1094_v23 = vsub.f32 %v1073_v20, %v1093_v21 }
 0x3c1   : > { %1370 = vmatpush.xpose.msra.mxu3 %v1285_v63 }
 0x3c2   : > { %1155 = vmatmul.f32.vlgmr.msrb.gmra.mxu0 %v1094_v23  ;;  %v1095_v25 = vand.u32 4294901760, %v1094_v23 }
 0x3c3   : > { %1397 = vmatpush.xpose.msrb.mxu0 %v1314_v1 }
 0x3c4   : > { %1180 = vmatmul.f32.vlgmr.msrb.gmra.mxu1 %v1095_v25  ;;  %v1096_v26 = vsub.f32 %v1094_v23, %v1095_v25  ;;  %v3025_v31 = vpop.permute.xlu0 %1635 }
 0x3c5   : > { %1422 = vmatpush.xpose.msrb.mxu1 %v1285_v63  ;;  %1372 = vmatpush.xpose.msra.mxu3 %v1287_v6 }
 0x3c6   : > { %v1097_v28 = vand.u32 4294901760, %v1096_v26 }
 0x3c7   : > { %1401 = vmatpush.xpose.msrb.mxu0 %v1320_v8  ;;  %v1443_v8 = vpop.permute.xlu1 %1442 }
 0x3c8   : > { %1098 = vmatmul.f32.vlgmr.msra.gmra.mxu2 %v1097_v28  ;;  %1230 = vmatmul.f32.vlgmr.msrb.gmra.mxu3 %v1093_v21  ;;  %v1463_v9 = vand.u32 4294901760, %v1443_v8 }
 0x3c9   : > { %1345 = vmatpush.xpose.msra.mxu2 %v1313_v0  ;;  %1424 = vmatpush.xpose.msrb.mxu1 %v1287_v6 }
 0x3ca   : > { %1294 = vmatmul.f32.vlgmr.msra.gmra.mxu0 %v1293_v27  ;;  %v1491_v10 = vsub.f32 %v1443_v8, %v1463_v9 }
 0x3cc   : > { %1325 = vmatmul.f32.vlgmr.msra.gmra.mxu1 %v1289_v16  ;;  %v3027_v33 = vpop.permute.xlu0 %1816  ;;  %v1492_v11 = vand.u32 4294901760, %v1491_v10  ;;  %1523 = vmatpush.msra.mxu0 %v1491_v10 }
 0x3cd   : > { %1348 = vmatpush.xpose.msra.mxu2 %v1319_v7  ;;  %1548 = vmatpush.msra.mxu1 %v1463_v9 }
 0x3ce   : > { %v1493_v12 = vsub.f32 %v1491_v10, %v1492_v11 }
 0x3cf   : > { %v1441_v13 = vpop.permute.xlu1 %1440 }
 0x3d0   : > { %1207 = vmatmul.f32.vlgmr.msrb.gmra.mxu2 %v1093_v21  ;;  %1376 = vmatmul.f32.vlgmr.msra.gmra.mxu3 %v1291_v22  ;;  %v1494_v14 = vand.u32 4294901760, %v1493_v12  ;;  %v1465_v15 = vand.u32 4294901760, %v1441_v13  ;;  %v1641_v22 = vsel %vm519_vm2, %v3025_v31, 0 }
 0x3d1   : > { %1464 = vmatpush.msrb.mxu2 %v1463_v9  ;;  %v1661_v24 = vand.u32 4294901760, %v1641_v22 }
 0x3d2   : > { %1403 = vmatmul.f32.vlgmr.msrb.gmra.mxu0 %v1289_v16  ;;  %1495 = vmatpush.msrb.mxu3 %v1494_v14 }
 0x3d3   : > { %1466 = vmatpush.msrb.mxu2 %v1465_v15  ;;  %1550 = vmatpush.msra.mxu1 %v1465_v15  ;;  %v1693_v27 = vsub.f32 %v1641_v22, %v1661_v24 }
 0x3d4   : > { %1426 = vmatmul.f32.vlgmr.msrb.gmra.mxu1 %v1289_v16  ;;  %v1497_v16 = vsub.f32 %v1441_v13, %v1465_v15 }
 0x3d6   : > { %1526 = vmatpush.msra.mxu0 %v1497_v16 }
 0x3d7   : > { %v1638_v18 = vpop.permute.xlu1 %1637 }
 0x3d8   : > { %1351 = vmatmul.f32.vlgmr.msra.gmra.mxu2 %v1290_v17  ;;  %v1498_v17 = vand.u32 4294901760, %v1497_v16  ;;  %v1643_v19 = vsel %vm519_vm2, %v1638_v18, 0 }
 0x3d9   : > { %1575 = vmatpush.msra.mxu2 %v1492_v11  ;;  %v1659_v21 = vand.u32 4294901760, %v1643_v19 }
 0x3db   : > { %1579 = vmatpush.msra.mxu2 %v1498_v17  ;;  %v1687_v23 = vsub.f32 %v1643_v19, %v1659_v21  ;;  %1660 = vmatpush.xpose.msrb.mxu0 %v1659_v21 }
 0x3dd   : > { %v1688_v25 = vand.u32 4294901760, %v1687_v23 }
 0x3df   : > { %v1689_v26 = vsub.f32 %v1687_v23, %v1688_v25  ;;  %1662 = vmatpush.xpose.msrb.mxu0 %v1661_v24 }
 0x3e1   : > { %v1690_v28 = vand.u32 4294901760, %v1689_v26 }
 0x3e3   : > { %1691 = vmatpush.xpose.msrb.mxu1 %v1690_v28 }
 0x431   : > { %v1065_v34 = vpop.xlane.xlu0 %1064 }
 0x432   : > { %2498 = vrcp.f32 %v1065_v34  ;;  %v1245_v46 = vand.u32 2147483648, %v1065_v34  ;;  %vm1239_vm6 = vweird.f32 %v1065_v34  ;;  %v1243_v47 = vand.u32 2147483647, %v1065_v34 }
 0x434   : > { %v1246_v51 = vor.u32 1.1754944e-38, %v1245_v46  ;;  %vm1244_vm8 = vcmp.eq.f32.partialorder %v1243_v47, 8.507059e+37 }
 0x438   : > { %v2499_v35 = vpop.eup %2498 }
 0x439   : > { %v1235_v36 = vmul.f32 %v2499_v35, %v1065_v34  ;;  %vm1240_vm5 = vweird.f32 %v2499_v35  ;;  %v1694_v34 = vand.u32 4294901760, %v1693_v27 }
 0x43a   : > { %vm1241_vm7 = vmor %vm1239_vm6, %vm1240_vm5 }
 0x43b   : > { %v1236_v37 = vsub.f32 1.0, %v1235_v36 }
 0x43d   : > { %v1237_v41 = vmul.f32 %v2499_v35, %v1236_v37  ;;  %v1632_v37 = vpop.permute.xlu1 %1631 }
 0x43e   : > { %v1639_v31 = vsel %vm519_vm2, %v1632_v37, 0 }
 0x43f   : > { %v1156_v38 = vpop.f32.mrf.mxu0  ;;  %v1238_v60 = vadd.f32 %v2499_v35, %v1237_v41  ;;  %v3040_v41 = vand.u32 4294901760, %v3027_v33 }
 0x441   : > { %v1181_v44 = vpop.f32.mrf.mxu1  ;;  %v1242_v50 = vsel %vm1241_vm7, %v2499_v35, %v1238_v60  ;;  %v1695_v35 = vsub.f32 %v1693_v27, %v1694_v34  ;;  %vm2001_vm7 = vcmask 261312  }
 0x442   : > { %v1247_v56 = vsel %vm1244_vm8, %v1246_v51, %v1242_v50  ;;  %vm2012_vm8 = vcmask 261120  }
 0x443   : > { %v1130_v39 = vpop.f32.mrf.mxu3  ;;  %v1696_v36 = vand.u32 4294901760, %v1695_v35 }
 0x445   : > { %1697 = vmatpush.xpose.msrb.mxu1 %v1696_v36 }
 0x447   : > { %v1295_v53 = vpop.f32.mrf.mxu0 }
 0x449   : > { %v1326_v55 = vpop.f32.mrf.mxu1 }
 0x44a   : > { %v1327_v58 = vadd.f32 %v1326_v55, %v1295_v53 }
 0x44b   : > { %v1099_v40 = vpop.f32.mrf.mxu2  ;;  %v1231_v52 = vpop.f32.mrf.mxu3 }
 0x44c   : > { %v1131_v42 = vadd.f32 %v1130_v39, %v1099_v40 }
 0x44e   : > { %v1157_v45 = vadd.f32 %v1156_v38, %v1131_v42  ;;  %v1663_v42 = vand.u32 4294901760, %v1639_v31 }
 0x44f   : > { %v1404_v2 = vpop.f32.mrf.mxu0 }
 0x450   : > { %v1182_v62 = vadd.f32 %v1181_v44, %v1157_v45  ;;  %v1865_v44 = vsub.f32 %v3027_v33, %v3040_v41  ;;  %v1664_v45 = vsub.f32 %v1639_v31, %v1663_v42 }
 0x451   : > { %v1427_v4 = vpop.f32.mrf.mxu1 }
 0x452   : > { %v1866_v47 = vand.u32 4294901760, %v1865_v44 }
 0x453   : > { %v1208_v48 = vpop.f32.mrf.mxu2  ;;  %v1377_v0 = vpop.f32.mrf.mxu3 }
 0x454   : > { %v1209_v49 = vadd.f32 %v1208_v48, %v1182_v62  ;;  %v1867_v51 = vsub.f32 %v1865_v44, %v1866_v47 }
 0x456   : > { %v1232_v54 = vadd.f32 %v1231_v52, %v1209_v49  ;;  %v1665_v49 = vand.u32 4294901760, %v1664_v45 }
 0x458   : > { %v1248_v57 = vmul.f32 %v1247_v56, %v1232_v54  ;;  %v1666_v52 = vsub.f32 %v1664_v45, %v1665_v49  ;;  %v1868_v54 = vand.u32 4294901760, %v1867_v51 }
 0x45a   : > { %1250 = vrot.lane.b32.xlu0 %v1248_v57, %s2743_s8  ;;  %v1667_v55 = vand.u32 4294901760, %v1666_v52 }
 0x45b   : > { %v1352_v59 = vpop.f32.mrf.mxu2 }
 0x45c   : > { %v1353_v63 = vadd.f32 %v1352_v59, %v1327_v58 }
 0x45e   : > { %v1378_v1 = vadd.f32 %v1377_v0, %v1353_v63 }
 0x460   : > { %v1405_v3 = vadd.f32 %v1404_v2, %v1378_v1 }
 0x462   : > { %v1428_v5 = vadd.f32 %v1427_v4, %v1405_v3 }
 0x464   : > { %v1430_v6 = vsel %vm508_vm3, %v1428_v5, -1e+30 }
 0x465   : > { %v1431_v7 = vsel %vm687_vm4, %v1430_v6, -inf }
 0x466   : > { %1432 = vmax.xlane.f32.xlu2 %v1431_v7 }
 0x47e   : > { %1814 = vrot.lane.b32.xlu2 %v2958_v61, %s2740_s11  ;;  %v1499_v61 = vsub.f32 %v1497_v16, %v1498_v17  ;;  %s2203_s11 = scalar_lea.sflag [#allocation6], %s262_s4 }
 0x480   : > { %v1500_v20 = vand.u32 4294901760, %v1499_v61 }
 0x482   : > { %1501 = vmatpush.msrb.mxu3 %v1500_v20 }
 0x484   : > { %1600 = vmatpush.msra.mxu3 %v1463_v9 }
 0x486   : > { %1602 = vmatpush.msra.mxu3 %v1465_v15 }
 0x4d9   : > { %v1433_v38 = vpop.xlane.xlu2 %1432 }
 0x4da   : > { %v1434_v39 = vsub.f32 %v1430_v6, %v1433_v38 }
 0x4dc   : > { %v1435_v40 = vmul.f32 1.442695, %v1434_v39  ;;  %v694_v39 = vsel %vm687_vm4, %v2988_v43, 0.0 }
 0x4de   : > { %2500 = vpow2.f32 %v1435_v40 }
 0x4e1   : > { %v1815_v57 = vpop.permute.xlu2 %1814 }
 0x4e2   : > { %v1839_v58 = vand.u32 4294901760, %v1815_v57 }
 0x4e4   : > { %v2501_v60 = vpop.eup %2500  ;;  %v1871_v59 = vsub.f32 %v1815_v57, %v1839_v58 }
 0x4e5   : > { %v1437_v46 = vsel %vm687_vm4, %v2501_v60, 0.0  ;;  %v1447_v62 = vsel %vm687_vm4, %v2501_v60, 0 }
 0x4e6   : > { %1438 = vadd.xlane.f32.xlu2 %v1437_v46  ;;  %v1467_v48 = vand.u32 4294901760, %v1447_v62  ;;  %v1872_v63 = vand.u32 4294901760, %v1871_v59 }
 0x4e8   : > { %1503 = vmatmul.f32.vlgmr.msrb.gmra.mxu3 %v1467_v48  ;;  %v1468_v50 = vsub.f32 %v1447_v62, %v1467_v48 }
 0x4e9   : > { %1744 = vmatpush.xpose.msrb.mxu3 %v1659_v21 }
 0x4ea   : > { %1529 = vmatmul.f32.vlgmr.msra.gmra.mxu0 %v1468_v50  ;;  %v1469_v53 = vand.u32 4294901760, %v1468_v50 }
 0x4eb   : > { %1771 = vmatpush.xpose.msra.mxu0 %v1688_v25 }
 0x4ec   : > { %1554 = vmatmul.f32.vlgmr.msra.gmra.mxu1 %v1469_v53  ;;  %v1470_v33 = vsub.f32 %v1468_v50, %v1469_v53 }
 0x4ed   : > { %1796 = vmatpush.xpose.msra.mxu1 %v1659_v21  ;;  %1746 = vmatpush.xpose.msrb.mxu3 %v1661_v24 }
 0x4ee   : > { %v1471_v56 = vand.u32 4294901760, %v1470_v33 }
 0x4ef   : > { %1775 = vmatpush.xpose.msra.mxu0 %v1694_v34 }
 0x4f0   : > { %1472 = vmatmul.f32.vlgmr.msrb.gmra.mxu2 %v1471_v56  ;;  %1604 = vmatmul.f32.vlgmr.msra.gmra.mxu3 %v1467_v48 }
 0x4f1   : > { %1719 = vmatpush.xpose.msrb.mxu2 %v1687_v23  ;;  %1798 = vmatpush.xpose.msra.mxu1 %v1661_v24  ;;  %v1873_v23 = vsub.f32 %v1871_v59, %v1872_v63 }
 0x4f2   : > { %1668 = vmatmul.f32.vlgmr.msrb.gmra.mxu0 %v1667_v55  ;;  %1869 = vmatpush.msra.mxu3 %v1868_v54 }
 0x4f3   : > { %1897 = vmatpush.msrb.mxu0 %v1865_v44  ;;  %v1874_v24 = vand.u32 4294901760, %v1873_v23 }
 0x4f4   : > { %1699 = vmatmul.f32.vlgmr.msrb.gmra.mxu1 %v1663_v42 }
 0x4f5   : > { %1722 = vmatpush.xpose.msrb.mxu2 %v1693_v27  ;;  %1922 = vmatpush.msrb.mxu1 %v3040_v41 }
 0x4f6   : > { %1900 = vmatpush.msrb.mxu0 %v1871_v59  ;;  %1875 = vmatpush.msra.mxu3 %v1874_v24  ;;  %v2006_v24 = vld [vmem:[#allocation9 + $0x10] sm:$0xff] }
 0x4f7   : > { %1924 = vmatpush.msrb.mxu1 %v1839_v58 }
 0x4f8   : > { %1581 = vmatmul.f32.vlgmr.msra.gmra.mxu2 %v1467_v48  ;;  %1750 = vmatmul.f32.vlgmr.msrb.gmra.mxu3 %v1665_v49 }
 0x4f9   : > { %1838 = vmatpush.msra.mxu2 %v3040_v41  ;;  %1974 = vmatpush.msrb.mxu3 %v3040_v41 }
 0x4fa   : > { %1777 = vmatmul.f32.vlgmr.msra.gmra.mxu0 %v1663_v42 }
 0x4fb   : > { %1840 = vmatpush.msra.mxu2 %v1839_v58  ;;  %1976 = vmatpush.msrb.mxu3 %v1839_v58 }
 0x4fc   : > { %1800 = vmatmul.f32.vlgmr.msra.gmra.mxu1 %v1663_v42 }
 0x500   : > { %1725 = vmatmul.f32.vlgmr.msrb.gmra.mxu2 %v1664_v45 }
 0x501   : > { %1949 = vmatpush.msrb.mxu2 %v1866_v47 }
 0x503   : > { %1953 = vmatpush.msrb.mxu2 %v1872_v63 }
 0x559   : > { %v1439_v34 = vpop.xlane.xlu2 %1438 }
 0x55a   : > { %v1619_v60 = vand.u32 2147483648, %v1439_v34  ;;  %vm1613_vm10 = vweird.f32 %v1439_v34  ;;  %v1617_v46 = vand.u32 2147483647, %v1439_v34 }
 0x55c   : > { %v1620_v47 = vor.u32 1.1754944e-38, %v1619_v60  ;;  %vm1618_vm12 = vcmp.eq.f32.partialorder %v1617_v46, 8.507059e+37 }
 0x567   : > { %v1530_v0 = vpop.f32.mrf.mxu0 }
 0x569   : > { %v1555_v4 = vpop.f32.mrf.mxu1 }
 0x56b   : > { %v1504_v1 = vpop.f32.mrf.mxu3 }
 0x56f   : > { %v1669_v10 = vpop.f32.mrf.mxu0 }
 0x571   : > { %v1700_v12 = vpop.f32.mrf.mxu1 }
 0x572   : > { %v1701_v13 = vadd.f32 %v1700_v12, %v1669_v10 }
 0x573   : > { %v1473_v2 = vpop.f32.mrf.mxu2  ;;  %v1605_v9 = vpop.f32.mrf.mxu3 }
 0x574   : > { %v1505_v3 = vadd.f32 %v1504_v1, %v1473_v2 }
 0x576   : > { %v1531_v5 = vadd.f32 %v1530_v0, %v1505_v3 }
 0x577   : > { %v1778_v61 = vpop.f32.mrf.mxu0 }
 0x578   : > { %v1556_v6 = vadd.f32 %v1555_v4, %v1531_v5 }
 0x579   : > { %v1801_v19 = vpop.f32.mrf.mxu1 }
 0x57b   : > { %v1582_v7 = vpop.f32.mrf.mxu2  ;;  %v1751_v16 = vpop.f32.mrf.mxu3 }
 0x57c   : > { %v1583_v8 = vadd.f32 %v1582_v7, %v1556_v6  ;;  %v1251_v7 = vpop.permute.xlu0 %1250 }
 0x57e   : > { %v1606_v11 = vadd.f32 %v1605_v9, %v1583_v8 }
 0x583   : > { %v1726_v14 = vpop.f32.mrf.mxu2 }
 0x584   : > { %v1727_v15 = vadd.f32 %v1726_v14, %v1701_v13 }
 0x586   : > { %v1752_v17 = vadd.f32 %v1751_v16, %v1727_v15 }
 0x588   : > { %v1779_v18 = vadd.f32 %v1778_v61, %v1752_v17 }
 0x58a   : > { %v1802_v20 = vadd.f32 %v1801_v19, %v1779_v18 }
 0x58c   : > { %v1804_v21 = vsel %vm508_vm3, %v1802_v20, -1e+30  ;;  %vm1627_vm3 = vcmask 195712  }
 0x58d   : > { %v1805_v22 = vsel %vm687_vm4, %v1804_v21, -inf }
 0x58e   : > { %1806 = vmax.xlane.f32.xlu1 %v1805_v22  ;;  %v2007_v22 = vld [vmem:[#allocation9 + $0x18] sm:$0xff] }
 0x58f   : > { %v2028_v23 = vand.u32 4294901760, %v2007_v22 }
 0x591   : > { %2029 = vmatpush.msra.mxu0 %v2028_v23 }
 0x601   : > { %v1807_v25 = vpop.xlane.xlu1 %1806 }
 0x602   : > { %v1808_v26 = vsub.f32 %v1804_v21, %v1807_v25  ;;  %v2058_v25 = vsub.f32 %v2007_v22, %v2028_v23 }
 0x604   : > { %v1809_v27 = vmul.f32 1.442695, %v1808_v26  ;;  %v2030_v26 = vand.u32 4294901760, %v2006_v24 }
 0x606   : > { %2502 = vpow2.f32 %v1809_v27  ;;  %v2005_v27 = vld [vmem:[#allocation9 + $0x8] sm:$0xff]  ;;  %2031 = vmatpush.msra.mxu0 %v2030_v26 }
 0x607   : > { %2504 = vrcp.f32 %v1439_v34 }
 0x60c   : > { %v2503_v28 = vpop.eup %2502 }
 0x60d   : > { %v1811_v35 = vsel %vm687_vm4, %v2503_v28, 0.0  ;;  %v1821_v29 = vsel %vm687_vm4, %v2503_v28, 0  ;;  %v2505_v31 = vpop.eup %2504  ;;  %v2004_v28 = vld [vmem:[#allocation9] sm:$0xff] }
 0x60e   : > { %1812 = vadd.xlane.f32.xlu1 %v1811_v35  ;;  %v1841_v30 = vand.u32 4294901760, %v1821_v29  ;;  %v1609_v41 = vmul.f32 %v2505_v31, %v1439_v34  ;;  %vm1614_vm9 = vweird.f32 %v2505_v31  ;;  %v2032_v34 = vand.u32 4294901760, %v2005_v27 }
 0x60f   : > { %vm1615_vm11 = vmor %vm1613_vm10, %vm1614_vm9  ;;  %v2034_v35 = vand.u32 4294901760, %v2004_v28 }
 0x610   : > { %1877 = vmatmul.f32.vlgmr.msra.gmra.mxu3 %v1841_v30  ;;  %v1842_v36 = vsub.f32 %v1821_v29, %v1841_v30  ;;  %v1610_v42 = vsub.f32 1.0, %v1609_v41  ;;  %v2059_v29 = vand.u32 4294901760, %v2058_v25  ;;  %2033 = vmatpush.msra.mxu0 %v2032_v34 }
 0x611   : > { %2129 = vmatpush.msra.mxu3 %v2028_v23 }
 0x612   : > { %1903 = vmatmul.f32.vlgmr.msrb.gmra.mxu0 %v1842_v36  ;;  %v1843_v37 = vand.u32 4294901760, %v1842_v36  ;;  %v1611_v44 = vmul.f32 %v2505_v31, %v1610_v42 }
 0x613   : > { %2131 = vmatpush.msra.mxu3 %v2030_v26  ;;  %2035 = vmatpush.msra.mxu0 %v2034_v35 }
 0x614   : > { %1928 = vmatmul.f32.vlgmr.msrb.gmra.mxu1 %v1843_v37  ;;  %v1844_v38 = vsub.f32 %v1842_v36, %v1843_v37  ;;  %v1612_v45 = vadd.f32 %v2505_v31, %v1611_v44  ;;  %v2070_v36 = vsub.f32 %v2005_v27, %v2032_v34  ;;  %v2076_v37 = vsub.f32 %v2004_v28, %v2034_v35 }
 0x615   : > { %2133 = vmatpush.msra.mxu3 %v2032_v34  ;;  %2158 = vmatpush.msrb.mxu0 %v2059_v29 }
 0x616   : > { %695 = vadd.xlane.f32.xlu1 %v694_v39  ;;  %v1845_v40 = vand.u32 4294901760, %v1844_v38  ;;  %v1616_v62 = vsel %vm1615_vm11, %v2505_v31, %v1612_v45  ;;  %v2060_v38 = vsub.f32 %v2058_v25, %v2059_v29  ;;  %v2071_v31 = vand.u32 4294901760, %v2070_v36 }
 0x617   : > { %v1621_v48 = vsel %vm1618_vm12, %v1620_v47, %v1616_v62  ;;  %2135 = vmatpush.msra.mxu3 %v2034_v35 }
 0x618   : > { %1846 = vmatmul.f32.vlgmr.msra.gmra.mxu2 %v1845_v40  ;;  %1978 = vmatmul.f32.vlgmr.msrb.gmra.mxu3 %v1841_v30  ;;  %v1622_v43 = vmul.f32 %v1621_v48, %v1606_v11  ;;  %v2077_v40 = vand.u32 4294901760, %v2076_v37  ;;  %v2061_v41 = vand.u32 4294901760, %v2060_v38  ;;  %v2072_v44 = vsub.f32 %v2070_v36, %v2071_v31 }
 0x619   : > { %2100 = vmatpush.msra.mxu2 %v2058_v25 }
 0x61a   : > { %v2078_v45 = vsub.f32 %v2076_v37, %v2077_v40  ;;  %2062 = vmatpush.msra.mxu1 %v2061_v41  ;;  %v2073_v46 = vand.u32 4294901760, %v2072_v44 }
 0x61c   : > { %v2079_v62 = vand.u32 4294901760, %v2078_v45 }
 0x620   : > { %1955 = vmatmul.f32.vlgmr.msrb.gmra.mxu2 %v1841_v30  ;;  %v2064_v30 = vsub.f32 %v2006_v24, %v2030_v26 }
 0x622   : > { %v2065_v39 = vand.u32 4294901760, %v2064_v30  ;;  %2103 = vmatpush.msra.mxu2 %v2064_v30 }
 0x624   : > { %v2066_v42 = vsub.f32 %v2064_v30, %v2065_v39  ;;  %2106 = vmatpush.msra.mxu2 %v2070_v36  ;;  %2162 = vmatpush.msrb.mxu0 %v2065_v39 }
 0x626   : > { %v2067_v60 = vand.u32 4294901760, %v2066_v42  ;;  %2109 = vmatpush.msra.mxu2 %v2076_v37  ;;  %2166 = vmatpush.msrb.mxu0 %v2071_v31 }
 0x628   : > { %2068 = vmatpush.msra.mxu1 %v2067_v60  ;;  %2170 = vmatpush.msrb.mxu0 %v2077_v40 }
 0x62a   : > { %2074 = vmatpush.msra.mxu1 %v2073_v46 }
 0x62c   : > { %2080 = vmatpush.msra.mxu1 %v2079_v62 }
 0x62e   : > { %2189 = vmatpush.msrb.mxu1 %v2028_v23 }
 0x62f   : > { %1624 = vrot.lane.b32.xlu1 %v1622_v43, %s2744_s5 }
 0x630   : > { %2191 = vmatpush.msrb.mxu1 %v2030_v26 }
 0x632   : > { %2193 = vmatpush.msrb.mxu1 %v2032_v34 }
 0x634   : > { %2195 = vmatpush.msrb.mxu1 %v2034_v35 }
 0x681   : > { %v1813_v49 = vpop.xlane.xlu1 %1812 }
 0x682   : > { %v1993_v11 = vand.u32 2147483648, %v1813_v49  ;;  %vm1987_vm5 = vweird.f32 %v1813_v49  ;;  %v1991_v15 = vand.u32 2147483647, %v1813_v49 }
 0x684   : > { %v1994_v61 = vor.u32 1.1754944e-38, %v1993_v11 }
 0x689   : > { %v696_v50 = vpop.xlane.xlu1 %695 }
 0x68a   : > { %2506 = vrcp.f32 %v696_v50  ;;  %v876_v55 = vand.u32 2147483648, %v696_v50  ;;  %v874_v57 = vand.u32 2147483647, %v696_v50  ;;  %vm870_vm14 = vweird.f32 %v696_v50 }
 0x68b   : > { %2508 = vrcp.f32 %v1813_v49 }
 0x68c   : > { %v877_v63 = vor.u32 1.1754944e-38, %v876_v55  ;;  %vm875_vm0 = vcmp.eq.f32.partialorder %v874_v57, 8.507059e+37 }
 0x68f   : > { %v1904_v8 = vpop.f32.mrf.mxu0 }
 0x690   : > { %v2507_v51 = vpop.eup %2506 }
 0x691   : > { %v2509_v52 = vpop.eup %2508  ;;  %v866_v53 = vmul.f32 %v2507_v51, %v696_v50  ;;  %vm871_vm13 = vweird.f32 %v2507_v51  ;;  %v1929_v12 = vpop.f32.mrf.mxu1 }
 0x692   : > { %v1983_v54 = vmul.f32 %v2509_v52, %v1813_v49  ;;  %vm872_vm15 = vmor %vm870_vm14, %vm871_vm13  ;;  %vm1988_vm4 = vweird.f32 %v2509_v52 }
 0x693   : > { %v867_v33 = vsub.f32 1.0, %v866_v53  ;;  %v1878_v2 = vpop.f32.mrf.mxu3  ;;  %vm1989_vm6 = vmor %vm1987_vm5, %vm1988_vm4 }
 0x694   : > { %v1984_v59 = vsub.f32 1.0, %v1983_v54 }
 0x695   : > { %v868_v56 = vmul.f32 %v2507_v51, %v867_v33  ;;  %v2493_v33 = vld [vmem:[%s3125_s3] ss:$0 sm:$0xff] }
 0x696   : > { %v1985_v5 = vmul.f32 %v2509_v52, %v1984_v59 }
 0x697   : > { %v869_v58 = vadd.f32 %v2507_v51, %v868_v56 }
 0x698   : > { %v1986_v10 = vadd.f32 %v2509_v52, %v1985_v5 }
 0x699   : > { %v873_v0 = vsel %vm872_vm15, %v2507_v51, %v869_v58 }
 0x69a   : > { %v878_v1 = vsel %vm875_vm0, %v877_v63, %v873_v0  ;;  %v1990_v17 = vsel %vm1989_vm6, %v2509_v52, %v1986_v10 }
 0x69b   : > { %v1847_v3 = vpop.f32.mrf.mxu2  ;;  %v879_v4 = vmul.f32 %v878_v1, %v3005_v32  ;;  %v1979_v18 = vpop.f32.mrf.mxu3 }
 0x69c   : > { %v1879_v6 = vadd.f32 %v1878_v2, %v1847_v3 }
 0x69d   : > { %880 = vst.msk [vmem:[#allocation3] sm:$0xff] %vm519_vm2, %v879_v4  ;;  %vm1992_vm2 = vcmp.eq.f32.partialorder %v1991_v15, 8.507059e+37 }
 0x69e   : > { %v1905_v9 = vadd.f32 %v1904_v8, %v1879_v6  ;;  %1254 = vst.msk [vmem:[#allocation3] sm:$0xff] %vm1253_vm1, %v1251_v7  ;;  %v1995_v20 = vsel %vm1992_vm2, %v1994_v61, %v1990_v17 }
 0x6a0   : > { %v1930_v14 = vadd.f32 %v1929_v12, %v1905_v9 }
 0x6a1   : > { %v1625_v13 = vpop.permute.xlu1 %1624 }
 0x6a2   : > { %1628 = vst.msk [vmem:[#allocation3] sm:$0xff] %vm1627_vm3, %v1625_v13 }
 0x6a3   : > { %v1956_v32 = vpop.f32.mrf.mxu2 }
 0x6a4   : > { %v1957_v16 = vadd.f32 %v1956_v32, %v1930_v14 }
 0x6a6   : > { %v1980_v19 = vadd.f32 %v1979_v18, %v1957_v16 }
 0x6a8   : > { %v1996_v21 = vmul.f32 %v1995_v20, %v1980_v19 }
 0x6aa   : > { %1998 = vrot.lane.b32.xlu2 %v1996_v21, %s2745_s26  ;;  %s2620_s26 = scalar_lea.hbm %s3156_s14, 32 }
 0x6ab   : > { %p2622_p3 = scmp.lt.s32.totalorder %s2620_s26, %s2616_s23 }
 0x6ad   : > { %p2623_p5 = por %p2622_p3, %p2621_p2 }
 0x6af   : > { %p2624_p7 = pnand %p2623_p5, %p2619_p0 }
 0x704   : > { %v1999_v47 = vpop.permute.xlu2 %1998 }
 0x705   : > { %2002 = vst.msk [vmem:[#allocation3] sm:$0xff] %vm2001_vm7, %v1999_v47 }
 0x70c   : > { %v2003_v48 = vld [vmem:[#allocation3] sm:$0xff] }
 0x70d   : > { %v2014_v43 = vsel %vm2012_vm8, %v2003_v48, 0 }
 0x70e   : > { %v2036_v49 = vand.u32 4294901760, %v2014_v43 }
 0x710   : > { %2082 = vmatmul.f32.vlgmr.msra.gmra.mxu1 %v2036_v49  ;;  %v2037_v50 = vsub.f32 %v2014_v43, %v2036_v49 }
 0x712   : > { %2112 = vmatmul.f32.vlgmr.msra.gmra.mxu2 %v2037_v50  ;;  %v2038_v51 = vand.u32 4294901760, %v2037_v50 }
 0x714   : > { %2139 = vmatmul.f32.vlgmr.msra.gmra.mxu3 %v2038_v51  ;;  %v2039_v52 = vsub.f32 %v2037_v50, %v2038_v51 }
 0x716   : > { %v2040_v53 = vand.u32 4294901760, %v2039_v52 }
 0x718   : > { %2041 = vmatmul.f32.vlgmr.msra.gmra.mxu0 %v2040_v53  ;;  %2197 = vmatmul.f32.vlgmr.msrb.gmra.mxu1 %v2036_v49 }
 0x720   : > { %2172 = vmatmul.f32.vlgmr.msrb.gmra.mxu0 %v2036_v49 }
 0x78d   : > { %v2083_v54 = vpop.f32.mrf.mxu1 }
 0x795   : > { %v2042_v55 = vpop.f32.mrf.mxu0  ;;  %v2113_v58 = vpop.f32.mrf.mxu2 }
 0x796   : > { %v2043_v56 = vadd.f32 %v2493_v33, %v2042_v55  ;;  %v2198_v3 = vpop.f32.mrf.mxu1 }
 0x797   : > { %v2140_v63 = vpop.f32.mrf.mxu3 }
 0x798   : > { %v2084_v57 = vadd.f32 %v2083_v54, %v2043_v56 }
 0x79a   : > { %v2114_v59 = vadd.f32 %v2113_v58, %v2084_v57 }
 0x79c   : > { %v2141_v0 = vadd.f32 %v2140_v63, %v2114_v59 }
 0x79d   : > { %v2173_v1 = vpop.f32.mrf.mxu0 }
 0x79e   : > { %v2174_v2 = vadd.f32 %v2173_v1, %v2141_v0 }
 0x7a0   : > { %v2199_v4 = vadd.f32 %v2198_v3, %v2174_v2 }
 0x7a2   : > { %2201 = vst.msk [vmem:[%s264_s30] sm:$0xff] %vm2012_vm8, %v2199_v4 }
 0x7a3   : > { %2627 = shalt.err (!%p2624_p7)
}
 0x7a4   : > { %2364 = dma.vmem_to_hbm [thread:$0]  (%p2841_p6), %s2218_s7, 128, %s2220_s21, %s2203_s11  }
 0x7a5 PF: > { %s3158_s4 = sld [smem:[#allocation14_spill]]  ;;  %p2386_p8 = scmp.ge.s32.totalorder %s2726_s25, 2 }
 0x7a7   : > { %p2378_p9 = pnand %p2386_p8, %p2847_p10 }
 0x7a9   : > { %p2379_p12 = pneg %p2378_p9 }
 0x7ab   : > { %s2231_s30 = sand.u32 1, %s3158_s4  }
 0x7ac   : > { %s2232_s6 = scalar_lea.sflag [#allocation6], %s2231_s30 }
 0x7ad   : > { %2681 = dma.done.wait (%p2379_p12), %s2232_s6, 128  }
 0x7ae   : > { %2683 = vsyncadd (%p2379_p12), %s2232_s6, 4294967168  ;;  %s21_s25 = sadd.s32 1, %s2726_s25   ;;  %s3160_s21 = sld [smem:[#allocation15_spill]] }
 0x7af   : > { %p18_p13 = scmp.ge.s32.totalorder %s21_s25, 6   ;;  %s3161_s23 = sld [smem:[#allocation18_spill]] }
 0x7b0   : > { %s3162_s10 = sld [smem:[#allocation19_spill]]  ;;  %s3163_s15 = smov %s2690_s16 }
 0x7b1   : > { %s3164_s16 = smov %s2694_s17  ;;  %s3165_s17 = smov %s2898_s2 }
 0x7b2   : > { %s3166_s18 = smov %s2702_s19  ;;  %s3167_s19 = smov %s2706_s20 }
 0x7b3   : > { %s3168_s20 = smov %s2895_s1  ;;  %s3169_s22 = smov %s2722_s24 }
 0x7b4   :  { %20 = sbr.rel (!%p18_p13) target bundleno = 14 (0xe), region = 94 }
 0x7b6   : > { %s3170_s24 = smov %s3162_s10 }
 0x7b9   :  { %2238 = vsyncpa [#allocation5], 1 }
 0x7ba   :  { %2240 = vsyncpa [#allocation5 + $0x1], 1 }
 0x7bb   :  { %2241 = vsyncpa [#allocation8], 1 }
 0x7bc   :  { %2242 = vsyncpa [#allocation6], 1 }
 0x7bd   :  { %2244 = vsyncpa [#allocation6 + $0x1], 1 }

</bundles_post_ra>
